<compile_context>
chip_gen: v7x
topology: tpu7x:2x2x1
jax: 0.10.0
libtpu: 0.0.40
codegen_flags: <defaults>
</compile_context>

<pallas_src>
import functools
import math

import jax
import jax.numpy as jnp
from jax.experimental import pallas as pl
from jax.experimental.pallas import tpu as pltpu


def _mm_t(a, w):
    """a @ w.T (PyTorch nn.Linear convention: w is (out, in)).

    MXU inputs are cast to the weight's dtype (f32 or bf16); accumulation is f32.
    """
    return jax.lax.dot_general(
        a.astype(w.dtype), w, (((1,), (1,)), ((), ())),
        preferred_element_type=jnp.float32,
    )


def transformer_layer_kernel(
    x_ref,        # (Bt*L, C)  VMEM -- Bt batch elements, rows grouped per element
    wqkv_ref,     # (3C, C)         -- folded+stacked q/k/v projection (scale folded into q)
    bqkv_ref,     # (1, 3C)         -- folded in-projection bias (q rows pre-scaled)
    wo_ref,       # (C, C)          -- MHA out-projection weight
    bo_ref,       # (1, C)          -- MHA out-projection bias
    wff_ref,      # (C, C)          -- folded fc2 @ fc1
    o_ref,        # (Bt*L, C)  VMEM
    x1_ref,       # (Bt*L, C)  VMEM f32 scratch: residual-1 slab
    *, num_heads, seq_len,
):
    rows, c = x_ref.shape
    L = seq_len
    bt = rows // L
    d = c // num_heads
    cdt = wqkv_ref.dtype                                # MXU input dtype (f32 or bf16)

    x = x_ref[...].astype(jnp.float32)                  # (Bt*L, C)

    # One fused QKV projection: outer bias-free q/k/v linears, the MHA in-projection,
    # its bias and the 1/sqrt(d) scale were all folded host-side into wqkv/bqkv.
    qkv = _mm_t(x, wqkv_ref[...]) + bqkv_ref[...].astype(jnp.float32)   # (Bt*L, 3C)

    wo = wo_ref[...]
    bo = bo_ref[...].astype(jnp.float32)

    for b in range(bt):                                 # static unroll over batch block
        r0 = b * L
        attn = jnp.zeros((L, c), jnp.float32)
        for h in range(num_heads):                      # static unroll over heads
            lo = h * d
            qh = qkv[r0:r0 + L, lo:lo + d].astype(cdt)                  # (L, d)
            kh = qkv[r0:r0 + L, c + lo:c + lo + d].astype(cdt)
            vh = qkv[r0:r0 + L, 2 * c + lo:2 * c + lo + d].astype(cdt)
            s = jax.lax.dot_general(                                    # (L, L) = qh @ kh.T
                qh, kh, (((1,), (1,)), ((), ())),
                preferred_element_type=jnp.float32)
            s = s - jnp.max(s, axis=-1, keepdims=True)                  # stable softmax
            p = jnp.exp(s)
            p = p * pl.reciprocal(jnp.sum(p, axis=-1, keepdims=True), approx=True)
            ctx = jnp.dot(p.astype(cdt), vh,                            # (L, d)
                          preferred_element_type=jnp.float32)
            # Accumulate this head directly through its out-projection column slice
            # (replaces lane-dim concatenate + one big out-proj matmul).
            attn = attn + jax.lax.dot_general(
                ctx.astype(cdt), wo[:, lo:lo + d], (((1,), (1,)), ((), ())),
                preferred_element_type=jnp.float32)                     # (L, C)
        # residual 1, staged in the VMEM scratch slab
        x1_ref[r0:r0 + L, :] = attn + bo + x[r0:r0 + L, :]

    # Folded FFN (fc2(fc1(x1)) == x1 @ (w2 @ w1).T) + residual 2, on the full block.
    x1 = x1_ref[...]
    y = _mm_t(x1, wff_ref[...]) + x1
    o_ref[...] = y.astype(o_ref.dtype)


def _vmem_limit_bytes(requested):
    cap = 128 * 1024 * 1024
    try:
        cap = int(pltpu.get_tpu_info().vmem_capacity_bytes)   # 64 MiB v7x, 128 MiB v5e/v6e
    except Exception:
        pass
    return int(min(max(requested, 32 * 1024 * 1024), int(0.75 * cap)))


def _pick_batch_block(n, seq_len, target_rows=256):
    """Largest divisor Bt of n with Bt*seq_len <= target_rows (fills the MXU M dim)."""
    bt = 1
    for cand in range(1, n + 1):
        if n % cand == 0 and cand * seq_len <= target_rows:
            bt = cand
    return bt


def _make_call(total_rows, rows_per_block, seq_len, c, num_heads,
               out_dtype, x_dtype, weight_dtype, single_buffer_weights):
    # Constant-index weights never change across the grid; single-buffer them when
    # the installed JAX supports pl.Buffered(1) (halves weight-resident VMEM).
    wkw = {"pipeline_mode": pl.Buffered(1)} if single_buffer_weights else {}

    def wspec(shape):
        return pl.BlockSpec(shape, lambda n: (0, 0), **wkw)

    w_itemsize = jnp.dtype(weight_dtype).itemsize
    weight_bytes = 5 * c * c * w_itemsize + 4 * c * 4          # wqkv+wo+wff, biases f32
    act_elems = rows_per_block * c
    need = (weight_bytes * (1 if single_buffer_weights else 2)
            + 2 * 2 * act_elems * jnp.dtype(x_dtype).itemsize  # x/out, double-buffered
            + 8 * act_elems * 4)                               # f32 intermediates (qkv, x1, ...)

    return pl.pallas_call(
        functools.partial(transformer_layer_kernel,
                          num_heads=num_heads, seq_len=seq_len),
        out_shape=jax.ShapeDtypeStruct((total_rows, c), out_dtype),
        grid_spec=pltpu.PrefetchScalarGridSpec(
            num_scalar_prefetch=0,
            grid=(total_rows // rows_per_block,),
            in_specs=[
                pl.BlockSpec((rows_per_block, c), lambda n: (n, 0)),   # x rows
                wspec((3 * c, c)),                                     # folded QKV weight
                wspec((1, 3 * c)),                                     # folded QKV bias
                wspec((c, c)),                                         # out-proj weight
                wspec((1, c)),                                         # out-proj bias
                wspec((c, c)),                                         # folded FFN weight
            ],
            out_specs=pl.BlockSpec((rows_per_block, c), lambda n: (n, 0)),
            scratch_shapes=[pltpu.VMEM((rows_per_block, c), jnp.float32)],
        ),
        compiler_params=pltpu.CompilerParams(
            dimension_semantics=("parallel",),                 # batch blocks -> megacore
            vmem_limit_bytes=_vmem_limit_bytes(need + (4 << 20)),
        ),
    )


def transformer_layer(x, params, num_heads, *, weight_dtype=None,
                      batch_block=None, seq_first=True):
    """x: (L, N, C) if seq_first (PyTorch MHA default), else (N, L, C). Same layout out.

    weight_dtype: None keeps the parameters' dtype (f32); jnp.bfloat16 halves weight
    VMEM/DMA bytes and uses the bf16-native MXU path (f32 accumulation kept).
    """
    wq, wk, wv, in_w, in_b, wo, bo, w1, w2 = params
    if seq_first:
        L, N, c = x.shape
        xb = jnp.transpose(x, (1, 0, 2))          # (N, L, C); callers already in batch-first
    else:                                         # layout can pass seq_first=False and skip it
        N, L, c = x.shape
        xb = x
    xb = xb.reshape(N * L, c)                     # lane-dense 2-D slab: C on lanes

    d = c // num_heads
    scale = 1.0 / math.sqrt(d)

    # ---- host-side algebraic folds (all in f32, cast at the end) -------------------
    wiq, wik, wiv = in_w[:c], in_w[c:2 * c], in_w[2 * c:]
    biq, bik, biv = in_b[:c], in_b[c:2 * c], in_b[2 * c:]
    w_q_eff = (wiq @ wq) * scale                  # outer q linear + in-proj + softmax scale
    w_k_eff = wik @ wk
    w_v_eff = wiv @ wv
    w_qkv = jnp.concatenate([w_q_eff, w_k_eff, w_v_eff], axis=0)          # (3C, C)
    b_qkv = jnp.concatenate([biq * scale, bik, biv]).reshape(1, 3 * c)    # (1, 3C)
    w_ff = w2 @ w1                                # fc2(fc1(x)) == x @ (w2 @ w1).T
    bo2 = bo.reshape(1, c)

    wdt = jnp.dtype(weight_dtype) if weight_dtype is not None else w_qkv.dtype
    w_qkv = w_qkv.astype(wdt)
    wo_c = wo.astype(wdt)
    w_ff = w_ff.astype(wdt)

    bt = batch_block if batch_block is not None else _pick_batch_block(N, L)
    assert N % bt == 0, (N, bt)
    rows_per_block = bt * L

    args = (xb, w_qkv, b_qkv, wo_c, bo2, w_ff)
    try:
        out = _make_call(N * L, rows_per_block, L, c, num_heads,
                         x.dtype, x.dtype, wdt, single_buffer_weights=True)(*args)
    except Exception:
        # pl.Buffered(1) not supported by this JAX/libtpu -> default double buffering.
        out = _make_call(N * L, rows_per_block, L, c, num_heads,
                         x.dtype, x.dtype, wdt, single_buffer_weights=False)(*args)

    out = out.reshape(N, L, c)
    if seq_first:
        out = jnp.transpose(out, (1, 0, 2))
    return out


def transformer_layer_ref(x, params, num_heads):
    """Plain-JAX reference mirroring the PyTorch forward (unfolded, f32)."""
    L, N, c = x.shape
    d = c // num_heads
    wq, wk, wv, in_w, in_b, wo, bo, w1, w2 = params
    lin = lambda a, w: jnp.einsum("lnc,oc->lno", a, w)

    q = lin(lin(x, wq), in_w[:c]) + in_b[:c]
    k = lin(lin(x, wk), in_w[c:2 * c]) + in_b[c:2 * c]
    v = lin(lin(x, wv), in_w[2 * c:]) + in_b[2 * c:]
    q = q / math.sqrt(d)

    qh = q.reshape(L, N, num_heads, d)
    kh = k.reshape(L, N, num_heads, d)
    vh = v.reshape(L, N, num_heads, d)
    s = jnp.einsum("lnhd,mnhd->nhlm", qh, kh)
    p = jax.nn.softmax(s, axis=-1)
    ctx = jnp.einsum("nhlm,mnhd->lnhd", p, vh).reshape(L, N, c)

    x1 = lin(ctx, wo) + bo + x
    return lin(lin(x1, w1), w2) + x1


if __name__ == "__main__":
    key = jax.random.PRNGKey(0)
    ks = jax.random.split(key, 10)

    L, N, C, NUM_HEADS = 8, 2, 32, 4              # seq=8, batch=2, hidden=32

    x = jax.random.normal(ks[0], (L, N, C), dtype=jnp.float32)

    def w(k, shape):
        return 0.1 * jax.random.normal(k, shape, dtype=jnp.float32)

    params = (
        w(ks[1], (C, C)), w(ks[2], (C, C)), w(ks[3], (C, C)),   # q, k, v Linear (no bias)
        w(ks[4], (3 * C, C)), w(ks[5], (3 * C,)),               # MHA in_proj weight / bias
        w(ks[6], (C, C)), w(ks[7], (C,)),                       # MHA out_proj weight / bias
        w(ks[8], (C, C)), w(ks[9], (C, C)),                     # fc1, fc2 (no bias)
    )

    ref = jax.block_until_ready(transformer_layer_ref(x, params, NUM_HEADS))

    # f32 weights (default)
    out_f32 = jax.block_until_ready(transformer_layer(x, params, NUM_HEADS))
    assert out_f32.shape == (L, N, C), out_f32.shape
    err_f32 = float(jnp.max(jnp.abs(out_f32 - ref)))
    assert err_f32 < 5e-3, f"f32 max err {err_f32}"

    # bf16 weights / MXU inputs, f32 accumulation (looser tolerance)
    out_bf16 = jax.block_until_ready(
        transformer_layer(x, params, NUM_HEADS, weight_dtype=jnp.bfloat16))
    err_bf16 = float(jnp.max(jnp.abs(out_bf16 - ref)))
    assert err_bf16 < 5e-2, f"bf16 max err {err_bf16}"

    print("KERNEL_OK")
</pallas_src>

<mosaic_0001>
module attributes {stable_mosaic.version = 11 : i64} {
  func.func @transformer_layer_kernel(%arg0: i32, %arg1: memref<16x32xf32, #tpu.memory_space<vmem>>, %arg2: memref<96x32xf32, #tpu.memory_space<vmem>>, %arg3: memref<1x96xf32, #tpu.memory_space<vmem>>, %arg4: memref<32x32xf32, #tpu.memory_space<vmem>>, %arg5: memref<1x32xf32, #tpu.memory_space<vmem>>, %arg6: memref<32x32xf32, #tpu.memory_space<vmem>>, %arg7: memref<16x32xf32, #tpu.memory_space<vmem>>, %arg8: memref<16x32xf32, #tpu.memory_space<vmem>>) attributes {dimension_semantics = [#tpu.dimension_semantics<parallel>], iteration_bounds = array<i64: 1>, scalar_prefetch = 0 : i64, scratch_operands = 1 : i64, tpu.core_type = #tpu.core_type<tc>, window_params = [{transform_indices = @transform_0, window_bounds = array<i64: 16, 32>}, {pipeline_mode = #tpu.pipeline_mode<synchronous>, transform_indices = @transform_1, window_bounds = array<i64: 96, 32>}, {pipeline_mode = #tpu.pipeline_mode<synchronous>, transform_indices = @transform_2, window_bounds = array<i64: 1, 96>}, {pipeline_mode = #tpu.pipeline_mode<synchronous>, transform_indices = @transform_3, window_bounds = array<i64: 32, 32>}, {pipeline_mode = #tpu.pipeline_mode<synchronous>, transform_indices = @transform_4, window_bounds = array<i64: 1, 32>}, {pipeline_mode = #tpu.pipeline_mode<synchronous>, transform_indices = @transform_5, window_bounds = array<i64: 32, 32>}, {transform_indices = @transform_6, window_bounds = array<i64: 16, 32>}]} {
    %c0 = arith.constant 0 : index
    %c0_0 = arith.constant 0 : index
    %0 = vector.load %arg1[%c0, %c0_0] : memref<16x32xf32, #tpu.memory_space<vmem>>, vector<16x32xf32>
    %c0_1 = arith.constant 0 : index
    %c0_2 = arith.constant 0 : index
    %1 = vector.load %arg2[%c0_1, %c0_2] : memref<96x32xf32, #tpu.memory_space<vmem>>, vector<96x32xf32>
    %cst = arith.constant dense<0.000000e+00> : vector<16x96xf32>
    %2 = tpu.matmul %0, %1, %cst {dimension_numbers = #tpu.dot_dimension_numbers<[1], [1], [0], [0], [0, 0, 1, 0], [], []>} : vector<16x32xf32>, vector<96x32xf32>, vector<16x96xf32> -> vector<16x96xf32>
    %c0_3 = arith.constant 0 : index
    %c0_4 = arith.constant 0 : index
    %3 = vector.load %arg3[%c0_3, %c0_4] : memref<1x96xf32, #tpu.memory_space<vmem>>, vector<1x96xf32>
    %4 = vector.broadcast %3 : vector<1x96xf32> to vector<16x96xf32>
    %5 = arith.addf %2, %4 : vector<16x96xf32>
    %c0_5 = arith.constant 0 : index
    %c0_6 = arith.constant 0 : index
    %6 = vector.load %arg4[%c0_5, %c0_6] : memref<32x32xf32, #tpu.memory_space<vmem>>, vector<32x32xf32>
    %c0_7 = arith.constant 0 : index
    %c0_8 = arith.constant 0 : index
    %7 = vector.load %arg5[%c0_7, %c0_8] : memref<1x32xf32, #tpu.memory_space<vmem>>, vector<1x32xf32>
    %cst_9 = arith.constant 0.000000e+00 : f32
    %8 = vector.broadcast %cst_9 : f32 to vector<8x32xf32>
    %9 = vector.extract_strided_slice %5 {offsets = [0, 0], sizes = [8, 8], strides = [1, 1]} : vector<16x96xf32> to vector<8x8xf32>
    %10 = vector.extract_strided_slice %5 {offsets = [0, 32], sizes = [8, 8], strides = [1, 1]} : vector<16x96xf32> to vector<8x8xf32>
    %11 = vector.extract_strided_slice %5 {offsets = [0, 64], sizes = [8, 8], strides = [1, 1]} : vector<16x96xf32> to vector<8x8xf32>
    %cst_10 = arith.constant dense<0.000000e+00> : vector<8x8xf32>
    %12 = tpu.matmul %9, %10, %cst_10 {dimension_numbers = #tpu.dot_dimension_numbers<[1], [1], [0], [0], [0, 0, 1, 0], [], []>} : vector<8x8xf32>, vector<8x8xf32>, vector<8x8xf32> -> vector<8x8xf32>
    %cst_11 = arith.constant dense<0xFF800000> : vector<8xf32>
    %13 = vector.multi_reduction <maximumf>, %12, %cst_11 [1] : vector<8x8xf32> to vector<8xf32>
    %14 = vector.shape_cast %13 : vector<8xf32> to vector<8x1xf32>
    %15 = vector.broadcast %14 : vector<8x1xf32> to vector<8x8xf32>
    %16 = arith.subf %12, %15 : vector<8x8xf32>
    %17 = math.exp %16 : vector<8x8xf32>
    %cst_12 = arith.constant dense<0.000000e+00> : vector<8xf32>
    %18 = vector.multi_reduction <add>, %17, %cst_12 [1] : vector<8x8xf32> to vector<8xf32>
    %19 = vector.shape_cast %18 : vector<8xf32> to vector<8x1xf32>
    %20 = tpu.reciprocal %19 {approx = true} : vector<8x1xf32> -> vector<8x1xf32>
    %21 = vector.broadcast %20 : vector<8x1xf32> to vector<8x8xf32>
    %22 = arith.mulf %17, %21 : vector<8x8xf32>
    %cst_13 = arith.constant dense<0.000000e+00> : vector<8x8xf32>
    %23 = tpu.matmul %22, %11, %cst_13 {dimension_numbers = #tpu.dot_dimension_numbers<[1], [0], [0], [1], [0, 0, 1, 1], [], []>} : vector<8x8xf32>, vector<8x8xf32>, vector<8x8xf32> -> vector<8x8xf32>
    %24 = vector.extract_strided_slice %6 {offsets = [0, 0], sizes = [32, 8], strides = [1, 1]} : vector<32x32xf32> to vector<32x8xf32>
    %cst_14 = arith.constant dense<0.000000e+00> : vector<8x32xf32>
    %25 = tpu.matmul %23, %24, %cst_14 {dimension_numbers = #tpu.dot_dimension_numbers<[1], [1], [0], [0], [0, 0, 1, 0], [], []>} : vector<8x8xf32>, vector<32x8xf32>, vector<8x32xf32> -> vector<8x32xf32>
    %26 = arith.addf %8, %25 : vector<8x32xf32>
    %27 = vector.extract_strided_slice %5 {offsets = [0, 8], sizes = [8, 8], strides = [1, 1]} : vector<16x96xf32> to vector<8x8xf32>
    %28 = vector.extract_strided_slice %5 {offsets = [0, 40], sizes = [8, 8], strides = [1, 1]} : vector<16x96xf32> to vector<8x8xf32>
    %29 = vector.extract_strided_slice %5 {offsets = [0, 72], sizes = [8, 8], strides = [1, 1]} : vector<16x96xf32> to vector<8x8xf32>
    %cst_15 = arith.constant dense<0.000000e+00> : vector<8x8xf32>
    %30 = tpu.matmul %27, %28, %cst_15 {dimension_numbers = #tpu.dot_dimension_numbers<[1], [1], [0], [0], [0, 0, 1, 0], [], []>} : vector<8x8xf32>, vector<8x8xf32>, vector<8x8xf32> -> vector<8x8xf32>
    %cst_16 = arith.constant dense<0xFF800000> : vector<8xf32>
    %31 = vector.multi_reduction <maximumf>, %30, %cst_16 [1] : vector<8x8xf32> to vector<8xf32>
    %32 = vector.shape_cast %31 : vector<8xf32> to vector<8x1xf32>
    %33 = vector.broadcast %32 : vector<8x1xf32> to vector<8x8xf32>
    %34 = arith.subf %30, %33 : vector<8x8xf32>
    %35 = math.exp %34 : vector<8x8xf32>
    %cst_17 = arith.constant dense<0.000000e+00> : vector<8xf32>
    %36 = vector.multi_reduction <add>, %35, %cst_17 [1] : vector<8x8xf32> to vector<8xf32>
    %37 = vector.shape_cast %36 : vector<8xf32> to vector<8x1xf32>
    %38 = tpu.reciprocal %37 {approx = true} : vector<8x1xf32> -> vector<8x1xf32>
    %39 = vector.broadcast %38 : vector<8x1xf32> to vector<8x8xf32>
    %40 = arith.mulf %35, %39 : vector<8x8xf32>
    %cst_18 = arith.constant dense<0.000000e+00> : vector<8x8xf32>
    %41 = tpu.matmul %40, %29, %cst_18 {dimension_numbers = #tpu.dot_dimension_numbers<[1], [0], [0], [1], [0, 0, 1, 1], [], []>} : vector<8x8xf32>, vector<8x8xf32>, vector<8x8xf32> -> vector<8x8xf32>
    %42 = vector.extract_strided_slice %6 {offsets = [0, 8], sizes = [32, 8], strides = [1, 1]} : vector<32x32xf32> to vector<32x8xf32>
    %cst_19 = arith.constant dense<0.000000e+00> : vector<8x32xf32>
    %43 = tpu.matmul %41, %42, %cst_19 {dimension_numbers = #tpu.dot_dimension_numbers<[1], [1], [0], [0], [0, 0, 1, 0], [], []>} : vector<8x8xf32>, vector<32x8xf32>, vector<8x32xf32> -> vector<8x32xf32>
    %44 = arith.addf %26, %43 : vector<8x32xf32>
    %45 = vector.extract_strided_slice %5 {offsets = [0, 16], sizes = [8, 8], strides = [1, 1]} : vector<16x96xf32> to vector<8x8xf32>
    %46 = vector.extract_strided_slice %5 {offsets = [0, 48], sizes = [8, 8], strides = [1, 1]} : vector<16x96xf32> to vector<8x8xf32>
    %47 = vector.extract_strided_slice %5 {offsets = [0, 80], sizes = [8, 8], strides = [1, 1]} : vector<16x96xf32> to vector<8x8xf32>
    %cst_20 = arith.constant dense<0.000000e+00> : vector<8x8xf32>
    %48 = tpu.matmul %45, %46, %cst_20 {dimension_numbers = #tpu.dot_dimension_numbers<[1], [1], [0], [0], [0, 0, 1, 0], [], []>} : vector<8x8xf32>, vector<8x8xf32>, vector<8x8xf32> -> vector<8x8xf32>
    %cst_21 = arith.constant dense<0xFF800000> : vector<8xf32>
    %49 = vector.multi_reduction <maximumf>, %48, %cst_21 [1] : vector<8x8xf32> to vector<8xf32>
    %50 = vector.shape_cast %49 : vector<8xf32> to vector<8x1xf32>
    %51 = vector.broadcast %50 : vector<8x1xf32> to vector<8x8xf32>
    %52 = arith.subf %48, %51 : vector<8x8xf32>
    %53 = math.exp %52 : vector<8x8xf32>
    %cst_22 = arith.constant dense<0.000000e+00> : vector<8xf32>
    %54 = vector.multi_reduction <add>, %53, %cst_22 [1] : vector<8x8xf32> to vector<8xf32>
    %55 = vector.shape_cast %54 : vector<8xf32> to vector<8x1xf32>
    %56 = tpu.reciprocal %55 {approx = true} : vector<8x1xf32> -> vector<8x1xf32>
    %57 = vector.broadcast %56 : vector<8x1xf32> to vector<8x8xf32>
    %58 = arith.mulf %53, %57 : vector<8x8xf32>
    %cst_23 = arith.constant dense<0.000000e+00> : vector<8x8xf32>
    %59 = tpu.matmul %58, %47, %cst_23 {dimension_numbers = #tpu.dot_dimension_numbers<[1], [0], [0], [1], [0, 0, 1, 1], [], []>} : vector<8x8xf32>, vector<8x8xf32>, vector<8x8xf32> -> vector<8x8xf32>
    %60 = vector.extract_strided_slice %6 {offsets = [0, 16], sizes = [32, 8], strides = [1, 1]} : vector<32x32xf32> to vector<32x8xf32>
    %cst_24 = arith.constant dense<0.000000e+00> : vector<8x32xf32>
    %61 = tpu.matmul %59, %60, %cst_24 {dimension_numbers = #tpu.dot_dimension_numbers<[1], [1], [0], [0], [0, 0, 1, 0], [], []>} : vector<8x8xf32>, vector<32x8xf32>, vector<8x32xf32> -> vector<8x32xf32>
    %62 = arith.addf %44, %61 : vector<8x32xf32>
    %63 = vector.extract_strided_slice %5 {offsets = [0, 24], sizes = [8, 8], strides = [1, 1]} : vector<16x96xf32> to vector<8x8xf32>
    %64 = vector.extract_strided_slice %5 {offsets = [0, 56], sizes = [8, 8], strides = [1, 1]} : vector<16x96xf32> to vector<8x8xf32>
    %65 = vector.extract_strided_slice %5 {offsets = [0, 88], sizes = [8, 8], strides = [1, 1]} : vector<16x96xf32> to vector<8x8xf32>
    %cst_25 = arith.constant dense<0.000000e+00> : vector<8x8xf32>
    %66 = tpu.matmul %63, %64, %cst_25 {dimension_numbers = #tpu.dot_dimension_numbers<[1], [1], [0], [0], [0, 0, 1, 0], [], []>} : vector<8x8xf32>, vector<8x8xf32>, vector<8x8xf32> -> vector<8x8xf32>
    %cst_26 = arith.constant dense<0xFF800000> : vector<8xf32>
    %67 = vector.multi_reduction <maximumf>, %66, %cst_26 [1] : vector<8x8xf32> to vector<8xf32>
    %68 = vector.shape_cast %67 : vector<8xf32> to vector<8x1xf32>
    %69 = vector.broadcast %68 : vector<8x1xf32> to vector<8x8xf32>
    %70 = arith.subf %66, %69 : vector<8x8xf32>
    %71 = math.exp %70 : vector<8x8xf32>
    %cst_27 = arith.constant dense<0.000000e+00> : vector<8xf32>
    %72 = vector.multi_reduction <add>, %71, %cst_27 [1] : vector<8x8xf32> to vector<8xf32>
    %73 = vector.shape_cast %72 : vector<8xf32> to vector<8x1xf32>
    %74 = tpu.reciprocal %73 {approx = true} : vector<8x1xf32> -> vector<8x1xf32>
    %75 = vector.broadcast %74 : vector<8x1xf32> to vector<8x8xf32>
    %76 = arith.mulf %71, %75 : vector<8x8xf32>
    %cst_28 = arith.constant dense<0.000000e+00> : vector<8x8xf32>
    %77 = tpu.matmul %76, %65, %cst_28 {dimension_numbers = #tpu.dot_dimension_numbers<[1], [0], [0], [1], [0, 0, 1, 1], [], []>} : vector<8x8xf32>, vector<8x8xf32>, vector<8x8xf32> -> vector<8x8xf32>
    %78 = vector.extract_strided_slice %6 {offsets = [0, 24], sizes = [32, 8], strides = [1, 1]} : vector<32x32xf32> to vector<32x8xf32>
    %cst_29 = arith.constant dense<0.000000e+00> : vector<8x32xf32>
    %79 = tpu.matmul %77, %78, %cst_29 {dimension_numbers = #tpu.dot_dimension_numbers<[1], [1], [0], [0], [0, 0, 1, 0], [], []>} : vector<8x8xf32>, vector<32x8xf32>, vector<8x32xf32> -> vector<8x32xf32>
    %80 = arith.addf %62, %79 : vector<8x32xf32>
    %81 = vector.broadcast %7 : vector<1x32xf32> to vector<8x32xf32>
    %82 = arith.addf %80, %81 : vector<8x32xf32>
    %83 = vector.extract_strided_slice %0 {offsets = [0, 0], sizes = [8, 32], strides = [1, 1]} : vector<16x32xf32> to vector<8x32xf32>
    %84 = arith.addf %82, %83 : vector<8x32xf32>
    %c0_30 = arith.constant 0 : index
    %c0_31 = arith.constant 0 : index
    %85 = vector.load %arg8[%c0_30, %c0_31] : memref<16x32xf32, #tpu.memory_space<vmem>>, vector<8x32xf32>
    tpu.vector_store %arg8[%c0_30, %c0_31], %84 {strides = array<i32>} : memref<16x32xf32, #tpu.memory_space<vmem>>, vector<8x32xf32>,
    %cst_32 = arith.constant 0.000000e+00 : f32
    %86 = vector.broadcast %cst_32 : f32 to vector<8x32xf32>
    %87 = vector.extract_strided_slice %5 {offsets = [8, 0], sizes = [8, 8], strides = [1, 1]} : vector<16x96xf32> to vector<8x8xf32>
    %88 = vector.extract_strided_slice %5 {offsets = [8, 32], sizes = [8, 8], strides = [1, 1]} : vector<16x96xf32> to vector<8x8xf32>
    %89 = vector.extract_strided_slice %5 {offsets = [8, 64], sizes = [8, 8], strides = [1, 1]} : vector<16x96xf32> to vector<8x8xf32>
    %cst_33 = arith.constant dense<0.000000e+00> : vector<8x8xf32>
    %90 = tpu.matmul %87, %88, %cst_33 {dimension_numbers = #tpu.dot_dimension_numbers<[1], [1], [0], [0], [0, 0, 1, 0], [], []>} : vector<8x8xf32>, vector<8x8xf32>, vector<8x8xf32> -> vector<8x8xf32>
    %cst_34 = arith.constant dense<0xFF800000> : vector<8xf32>
    %91 = vector.multi_reduction <maximumf>, %90, %cst_34 [1] : vector<8x8xf32> to vector<8xf32>
    %92 = vector.shape_cast %91 : vector<8xf32> to vector<8x1xf32>
    %93 = vector.broadcast %92 : vector<8x1xf32> to vector<8x8xf32>
    %94 = arith.subf %90, %93 : vector<8x8xf32>
    %95 = math.exp %94 : vector<8x8xf32>
    %cst_35 = arith.constant dense<0.000000e+00> : vector<8xf32>
    %96 = vector.multi_reduction <add>, %95, %cst_35 [1] : vector<8x8xf32> to vector<8xf32>
    %97 = vector.shape_cast %96 : vector<8xf32> to vector<8x1xf32>
    %98 = tpu.reciprocal %97 {approx = true} : vector<8x1xf32> -> vector<8x1xf32>
    %99 = vector.broadcast %98 : vector<8x1xf32> to vector<8x8xf32>
    %100 = arith.mulf %95, %99 : vector<8x8xf32>
    %cst_36 = arith.constant dense<0.000000e+00> : vector<8x8xf32>
    %101 = tpu.matmul %100, %89, %cst_36 {dimension_numbers = #tpu.dot_dimension_numbers<[1], [0], [0], [1], [0, 0, 1, 1], [], []>} : vector<8x8xf32>, vector<8x8xf32>, vector<8x8xf32> -> vector<8x8xf32>
    %102 = vector.extract_strided_slice %6 {offsets = [0, 0], sizes = [32, 8], strides = [1, 1]} : vector<32x32xf32> to vector<32x8xf32>
    %cst_37 = arith.constant dense<0.000000e+00> : vector<8x32xf32>
    %103 = tpu.matmul %101, %102, %cst_37 {dimension_numbers = #tpu.dot_dimension_numbers<[1], [1], [0], [0], [0, 0, 1, 0], [], []>} : vector<8x8xf32>, vector<32x8xf32>, vector<8x32xf32> -> vector<8x32xf32>
    %104 = arith.addf %86, %103 : vector<8x32xf32>
    %105 = vector.extract_strided_slice %5 {offsets = [8, 8], sizes = [8, 8], strides = [1, 1]} : vector<16x96xf32> to vector<8x8xf32>
    %106 = vector.extract_strided_slice %5 {offsets = [8, 40], sizes = [8, 8], strides = [1, 1]} : vector<16x96xf32> to vector<8x8xf32>
    %107 = vector.extract_strided_slice %5 {offsets = [8, 72], sizes = [8, 8], strides = [1, 1]} : vector<16x96xf32> to vector<8x8xf32>
    %cst_38 = arith.constant dense<0.000000e+00> : vector<8x8xf32>
    %108 = tpu.matmul %105, %106, %cst_38 {dimension_numbers = #tpu.dot_dimension_numbers<[1], [1], [0], [0], [0, 0, 1, 0], [], []>} : vector<8x8xf32>, vector<8x8xf32>, vector<8x8xf32> -> vector<8x8xf32>
    %cst_39 = arith.constant dense<0xFF800000> : vector<8xf32>
    %109 = vector.multi_reduction <maximumf>, %108, %cst_39 [1] : vector<8x8xf32> to vector<8xf32>
    %110 = vector.shape_cast %109 : vector<8xf32> to vector<8x1xf32>
    %111 = vector.broadcast %110 : vector<8x1xf32> to vector<8x8xf32>
    %112 = arith.subf %108, %111 : vector<8x8xf32>
    %113 = math.exp %112 : vector<8x8xf32>
    %cst_40 = arith.constant dense<0.000000e+00> : vector<8xf32>
    %114 = vector.multi_reduction <add>, %113, %cst_40 [1] : vector<8x8xf32> to vector<8xf32>
    %115 = vector.shape_cast %114 : vector<8xf32> to vector<8x1xf32>
    %116 = tpu.reciprocal %115 {approx = true} : vector<8x1xf32> -> vector<8x1xf32>
    %117 = vector.broadcast %116 : vector<8x1xf32> to vector<8x8xf32>
    %118 = arith.mulf %113, %117 : vector<8x8xf32>
    %cst_41 = arith.constant dense<0.000000e+00> : vector<8x8xf32>
    %119 = tpu.matmul %118, %107, %cst_41 {dimension_numbers = #tpu.dot_dimension_numbers<[1], [0], [0], [1], [0, 0, 1, 1], [], []>} : vector<8x8xf32>, vector<8x8xf32>, vector<8x8xf32> -> vector<8x8xf32>
    %120 = vector.extract_strided_slice %6 {offsets = [0, 8], sizes = [32, 8], strides = [1, 1]} : vector<32x32xf32> to vector<32x8xf32>
    %cst_42 = arith.constant dense<0.000000e+00> : vector<8x32xf32>
    %121 = tpu.matmul %119, %120, %cst_42 {dimension_numbers = #tpu.dot_dimension_numbers<[1], [1], [0], [0], [0, 0, 1, 0], [], []>} : vector<8x8xf32>, vector<32x8xf32>, vector<8x32xf32> -> vector<8x32xf32>
    %122 = arith.addf %104, %121 : vector<8x32xf32>
    %123 = vector.extract_strided_slice %5 {offsets = [8, 16], sizes = [8, 8], strides = [1, 1]} : vector<16x96xf32> to vector<8x8xf32>
    %124 = vector.extract_strided_slice %5 {offsets = [8, 48], sizes = [8, 8], strides = [1, 1]} : vector<16x96xf32> to vector<8x8xf32>
    %125 = vector.extract_strided_slice %5 {offsets = [8, 80], sizes = [8, 8], strides = [1, 1]} : vector<16x96xf32> to vector<8x8xf32>
    %cst_43 = arith.constant dense<0.000000e+00> : vector<8x8xf32>
    %126 = tpu.matmul %123, %124, %cst_43 {dimension_numbers = #tpu.dot_dimension_numbers<[1], [1], [0], [0], [0, 0, 1, 0], [], []>} : vector<8x8xf32>, vector<8x8xf32>, vector<8x8xf32> -> vector<8x8xf32>
    %cst_44 = arith.constant dense<0xFF800000> : vector<8xf32>
    %127 = vector.multi_reduction <maximumf>, %126, %cst_44 [1] : vector<8x8xf32> to vector<8xf32>
    %128 = vector.shape_cast %127 : vector<8xf32> to vector<8x1xf32>
    %129 = vector.broadcast %128 : vector<8x1xf32> to vector<8x8xf32>
    %130 = arith.subf %126, %129 : vector<8x8xf32>
    %131 = math.exp %130 : vector<8x8xf32>
    %cst_45 = arith.constant dense<0.000000e+00> : vector<8xf32>
    %132 = vector.multi_reduction <add>, %131, %cst_45 [1] : vector<8x8xf32> to vector<8xf32>
    %133 = vector.shape_cast %132 : vector<8xf32> to vector<8x1xf32>
    %134 = tpu.reciprocal %133 {approx = true} : vector<8x1xf32> -> vector<8x1xf32>
    %135 = vector.broadcast %134 : vector<8x1xf32> to vector<8x8xf32>
    %136 = arith.mulf %131, %135 : vector<8x8xf32>
    %cst_46 = arith.constant dense<0.000000e+00> : vector<8x8xf32>
    %137 = tpu.matmul %136, %125, %cst_46 {dimension_numbers = #tpu.dot_dimension_numbers<[1], [0], [0], [1], [0, 0, 1, 1], [], []>} : vector<8x8xf32>, vector<8x8xf32>, vector<8x8xf32> -> vector<8x8xf32>
    %138 = vector.extract_strided_slice %6 {offsets = [0, 16], sizes = [32, 8], strides = [1, 1]} : vector<32x32xf32> to vector<32x8xf32>
    %cst_47 = arith.constant dense<0.000000e+00> : vector<8x32xf32>
    %139 = tpu.matmul %137, %138, %cst_47 {dimension_numbers = #tpu.dot_dimension_numbers<[1], [1], [0], [0], [0, 0, 1, 0], [], []>} : vector<8x8xf32>, vector<32x8xf32>, vector<8x32xf32> -> vector<8x32xf32>
    %140 = arith.addf %122, %139 : vector<8x32xf32>
    %141 = vector.extract_strided_slice %5 {offsets = [8, 24], sizes = [8, 8], strides = [1, 1]} : vector<16x96xf32> to vector<8x8xf32>
    %142 = vector.extract_strided_slice %5 {offsets = [8, 56], sizes = [8, 8], strides = [1, 1]} : vector<16x96xf32> to vector<8x8xf32>
    %143 = vector.extract_strided_slice %5 {offsets = [8, 88], sizes = [8, 8], strides = [1, 1]} : vector<16x96xf32> to vector<8x8xf32>
    %cst_48 = arith.constant dense<0.000000e+00> : vector<8x8xf32>
    %144 = tpu.matmul %141, %142, %cst_48 {dimension_numbers = #tpu.dot_dimension_numbers<[1], [1], [0], [0], [0, 0, 1, 0], [], []>} : vector<8x8xf32>, vector<8x8xf32>, vector<8x8xf32> -> vector<8x8xf32>
    %cst_49 = arith.constant dense<0xFF800000> : vector<8xf32>
    %145 = vector.multi_reduction <maximumf>, %144, %cst_49 [1] : vector<8x8xf32> to vector<8xf32>
    %146 = vector.shape_cast %145 : vector<8xf32> to vector<8x1xf32>
    %147 = vector.broadcast %146 : vector<8x1xf32> to vector<8x8xf32>
    %148 = arith.subf %144, %147 : vector<8x8xf32>
    %149 = math.exp %148 : vector<8x8xf32>
    %cst_50 = arith.constant dense<0.000000e+00> : vector<8xf32>
    %150 = vector.multi_reduction <add>, %149, %cst_50 [1] : vector<8x8xf32> to vector<8xf32>
    %151 = vector.shape_cast %150 : vector<8xf32> to vector<8x1xf32>
    %152 = tpu.reciprocal %151 {approx = true} : vector<8x1xf32> -> vector<8x1xf32>
    %153 = vector.broadcast %152 : vector<8x1xf32> to vector<8x8xf32>
    %154 = arith.mulf %149, %153 : vector<8x8xf32>
    %cst_51 = arith.constant dense<0.000000e+00> : vector<8x8xf32>
    %155 = tpu.matmul %154, %143, %cst_51 {dimension_numbers = #tpu.dot_dimension_numbers<[1], [0], [0], [1], [0, 0, 1, 1], [], []>} : vector<8x8xf32>, vector<8x8xf32>, vector<8x8xf32> -> vector<8x8xf32>
    %156 = vector.extract_strided_slice %6 {offsets = [0, 24], sizes = [32, 8], strides = [1, 1]} : vector<32x32xf32> to vector<32x8xf32>
    %cst_52 = arith.constant dense<0.000000e+00> : vector<8x32xf32>
    %157 = tpu.matmul %155, %156, %cst_52 {dimension_numbers = #tpu.dot_dimension_numbers<[1], [1], [0], [0], [0, 0, 1, 0], [], []>} : vector<8x8xf32>, vector<32x8xf32>, vector<8x32xf32> -> vector<8x32xf32>
    %158 = arith.addf %140, %157 : vector<8x32xf32>
    %159 = vector.broadcast %7 : vector<1x32xf32> to vector<8x32xf32>
    %160 = arith.addf %158, %159 : vector<8x32xf32>
    %161 = vector.extract_strided_slice %0 {offsets = [8, 0], sizes = [8, 32], strides = [1, 1]} : vector<16x32xf32> to vector<8x32xf32>
    %162 = arith.addf %160, %161 : vector<8x32xf32>
    %c8 = arith.constant 8 : index
    %c0_53 = arith.constant 0 : index
    %163 = vector.load %arg8[%c8, %c0_53] : memref<16x32xf32, #tpu.memory_space<vmem>>, vector<8x32xf32>
    tpu.vector_store %arg8[%c8, %c0_53], %162 {strides = array<i32>} : memref<16x32xf32, #tpu.memory_space<vmem>>, vector<8x32xf32>,
    %c0_54 = arith.constant 0 : index
    %c0_55 = arith.constant 0 : index
    %164 = vector.load %arg8[%c0_54, %c0_55] : memref<16x32xf32, #tpu.memory_space<vmem>>, vector<16x32xf32>
    %c0_56 = arith.constant 0 : index
    %c0_57 = arith.constant 0 : index
    %165 = vector.load %arg6[%c0_56, %c0_57] : memref<32x32xf32, #tpu.memory_space<vmem>>, vector<32x32xf32>
    %cst_58 = arith.constant dense<0.000000e+00> : vector<16x32xf32>
    %166 = tpu.matmul %164, %165, %cst_58 {dimension_numbers = #tpu.dot_dimension_numbers<[1], [1], [0], [0], [0, 0, 1, 0], [], []>} : vector<16x32xf32>, vector<32x32xf32>, vector<16x32xf32> -> vector<16x32xf32>
    %167 = arith.addf %166, %164 : vector<16x32xf32>
    %c0_59 = arith.constant 0 : index
    %c0_60 = arith.constant 0 : index
    %168 = vector.load %arg7[%c0_59, %c0_60] : memref<16x32xf32, #tpu.memory_space<vmem>>, vector<16x32xf32>
    tpu.vector_store %arg7[%c0_59, %c0_60], %167 {strides = array<i32>} : memref<16x32xf32, #tpu.memory_space<vmem>>, vector<16x32xf32>,
    return
  }
  func.func @transform_0(%arg0: i32) -> (i32, i32) {
    %c0_i32 = arith.constant 0 : i32
    %c0_i32_0 = arith.constant 0 : i32
    return %arg0, %c0_i32 : i32, i32
  }
  func.func @transform_1(%arg0: i32) -> (i32, i32) {
    %c0_i32 = arith.constant 0 : i32
    %c0_i32_0 = arith.constant 0 : i32
    %c0_i32_1 = arith.constant 0 : i32
    return %c0_i32, %c0_i32_0 : i32, i32
  }
  func.func @transform_2(%arg0: i32) -> (i32, i32) {
    %c0_i32 = arith.constant 0 : i32
    %c0_i32_0 = arith.constant 0 : i32
    %c0_i32_1 = arith.constant 0 : i32
    return %c0_i32, %c0_i32_0 : i32, i32
  }
  func.func @transform_3(%arg0: i32) -> (i32, i32) {
    %c0_i32 = arith.constant 0 : i32
    %c0_i32_0 = arith.constant 0 : i32
    %c0_i32_1 = arith.constant 0 : i32
    return %c0_i32, %c0_i32_0 : i32, i32
  }
  func.func @transform_4(%arg0: i32) -> (i32, i32) {
    %c0_i32 = arith.constant 0 : i32
    %c0_i32_0 = arith.constant 0 : i32
    %c0_i32_1 = arith.constant 0 : i32
    return %c0_i32, %c0_i32_0 : i32, i32
  }
  func.func @transform_5(%arg0: i32) -> (i32, i32) {
    %c0_i32 = arith.constant 0 : i32
    %c0_i32_0 = arith.constant 0 : i32
    %c0_i32_1 = arith.constant 0 : i32
    return %c0_i32, %c0_i32_0 : i32, i32
  }
  func.func @transform_6(%arg0: i32) -> (i32, i32) {
    %c0_i32 = arith.constant 0 : i32
    %c0_i32_0 = arith.constant 0 : i32
    return %arg0, %c0_i32 : i32, i32
  }
}

module attributes {stable_mosaic.version = 11 : i64} {
  func.func @transformer_layer_kernel(%arg0: i32, %arg1: memref<16x32xf32, #tpu.memory_space<vmem>>, %arg2: memref<96x32xf32, #tpu.memory_space<vmem>>, %arg3: memref<1x96xf32, #tpu.memory_space<vmem>>, %arg4: memref<32x32xf32, #tpu.memory_space<vmem>>, %arg5: memref<1x32xf32, #tpu.memory_space<vmem>>, %arg6: memref<32x32xf32, #tpu.memory_space<vmem>>, %arg7: memref<16x32xf32, #tpu.memory_space<vmem>>, %arg8: memref<16x32xf32, #tpu.memory_space<vmem>>) attributes {dimension_semantics = [#tpu.dimension_semantics<parallel>], iteration_bounds = array<i64: 1>, scalar_prefetch = 0 : i64, scratch_operands = 1 : i64, tpu.core_type = #tpu.core_type<tc>, window_params = [{transform_indices = @transform_0, window_bounds = array<i64: 16, 32>}, {pipeline_mode = #tpu.pipeline_mode<synchronous>, transform_indices = @transform_1, window_bounds = array<i64: 96, 32>}, {pipeline_mode = #tpu.pipeline_mode<synchronous>, transform_indices = @transform_2, window_bounds = array<i64: 1, 96>}, {pipeline_mode = #tpu.pipeline_mode<synchronous>, transform_indices = @transform_3, window_bounds = array<i64: 32, 32>}, {pipeline_mode = #tpu.pipeline_mode<synchronous>, transform_indices = @transform_4, window_bounds = array<i64: 1, 32>}, {pipeline_mode = #tpu.pipeline_mode<synchronous>, transform_indices = @transform_5, window_bounds = array<i64: 32, 32>}, {transform_indices = @transform_6, window_bounds = array<i64: 16, 32>}]} {
    %c0 = arith.constant 0 : index
    %c0_0 = arith.constant 0 : index
    %0 = vector.load %arg1[%c0, %c0_0] : memref<16x32xf32, #tpu.memory_space<vmem>>, vector<16x32xf32>
    %c0_1 = arith.constant 0 : index
    %c0_2 = arith.constant 0 : index
    %1 = vector.load %arg2[%c0_1, %c0_2] : memref<96x32xf32, #tpu.memory_space<vmem>>, vector<96x32xf32>
    %cst = arith.constant dense<0.000000e+00> : vector<16x96xf32>
    %2 = tpu.matmul %0, %1, %cst {dimension_numbers = #tpu.dot_dimension_numbers<[1], [1], [0], [0], [0, 0, 1, 0], [], []>} : vector<16x32xf32>, vector<96x32xf32>, vector<16x96xf32> -> vector<16x96xf32>
    %c0_3 = arith.constant 0 : index
    %c0_4 = arith.constant 0 : index
    %3 = vector.load %arg3[%c0_3, %c0_4] : memref<1x96xf32, #tpu.memory_space<vmem>>, vector<1x96xf32>
    %4 = vector.broadcast %3 : vector<1x96xf32> to vector<16x96xf32>
    %5 = arith.addf %2, %4 : vector<16x96xf32>
    %c0_5 = arith.constant 0 : index
    %c0_6 = arith.constant 0 : index
    %6 = vector.load %arg4[%c0_5, %c0_6] : memref<32x32xf32, #tpu.memory_space<vmem>>, vector<32x32xf32>
    %c0_7 = arith.constant 0 : index
    %c0_8 = arith.constant 0 : index
    %7 = vector.load %arg5[%c0_7, %c0_8] : memref<1x32xf32, #tpu.memory_space<vmem>>, vector<1x32xf32>
    %cst_9 = arith.constant 0.000000e+00 : f32
    %8 = vector.broadcast %cst_9 : f32 to vector<8x32xf32>
    %9 = vector.extract_strided_slice %5 {offsets = [0, 0], sizes = [8, 8], strides = [1, 1]} : vector<16x96xf32> to vector<8x8xf32>
    %10 = vector.extract_strided_slice %5 {offsets = [0, 32], sizes = [8, 8], strides = [1, 1]} : vector<16x96xf32> to vector<8x8xf32>
    %11 = vector.extract_strided_slice %5 {offsets = [0, 64], sizes = [8, 8], strides = [1, 1]} : vector<16x96xf32> to vector<8x8xf32>
    %cst_10 = arith.constant dense<0.000000e+00> : vector<8x8xf32>
    %12 = tpu.matmul %9, %10, %cst_10 {dimension_numbers = #tpu.dot_dimension_numbers<[1], [1], [0], [0], [0, 0, 1, 0], [], []>} : vector<8x8xf32>, vector<8x8xf32>, vector<8x8xf32> -> vector<8x8xf32>
    %cst_11 = arith.constant dense<0xFF800000> : vector<8xf32>
    %13 = vector.multi_reduction <maximumf>, %12, %cst_11 [1] : vector<8x8xf32> to vector<8xf32>
    %14 = vector.shape_cast %13 : vector<8xf32> to vector<8x1xf32>
    %15 = vector.broadcast %14 : vector<8x1xf32> to vector<8x8xf32>
    %16 = arith.subf %12, %15 : vector<8x8xf32>
    %17 = math.exp %16 : vector<8x8xf32>
    %cst_12 = arith.constant dense<0.000000e+00> : vector<8xf32>
    %18 = vector.multi_reduction <add>, %17, %cst_12 [1] : vector<8x8xf32> to vector<8xf32>
    %19 = vector.shape_cast %18 : vector<8xf32> to vector<8x1xf32>
    %20 = tpu.reciprocal %19 {approx = true} : vector<8x1xf32> -> vector<8x1xf32>
    %21 = vector.broadcast %20 : vector<8x1xf32> to vector<8x8xf32>
    %22 = arith.mulf %17, %21 : vector<8x8xf32>
    %cst_13 = arith.constant dense<0.000000e+00> : vector<8x8xf32>
    %23 = tpu.matmul %22, %11, %cst_13 {dimension_numbers = #tpu.dot_dimension_numbers<[1], [0], [0], [1], [0, 0, 1, 1], [], []>} : vector<8x8xf32>, vector<8x8xf32>, vector<8x8xf32> -> vector<8x8xf32>
    %24 = vector.extract_strided_slice %6 {offsets = [0, 0], sizes = [32, 8], strides = [1, 1]} : vector<32x32xf32> to vector<32x8xf32>
    %cst_14 = arith.constant dense<0.000000e+00> : vector<8x32xf32>
    %25 = tpu.matmul %23, %24, %cst_14 {dimension_numbers = #tpu.dot_dimension_numbers<[1], [1], [0], [0], [0, 0, 1, 0], [], []>} : vector<8x8xf32>, vector<32x8xf32>, vector<8x32xf32> -> vector<8x32xf32>
    %26 = arith.addf %8, %25 : vector<8x32xf32>
    %27 = vector.extract_strided_slice %5 {offsets = [0, 8], sizes = [8, 8], strides = [1, 1]} : vector<16x96xf32> to vector<8x8xf32>
    %28 = vector.extract_strided_slice %5 {offsets = [0, 40], sizes = [8, 8], strides = [1, 1]} : vector<16x96xf32> to vector<8x8xf32>
    %29 = vector.extract_strided_slice %5 {offsets = [0, 72], sizes = [8, 8], strides = [1, 1]} : vector<16x96xf32> to vector<8x8xf32>
    %cst_15 = arith.constant dense<0.000000e+00> : vector<8x8xf32>
    %30 = tpu.matmul %27, %28, %cst_15 {dimension_numbers = #tpu.dot_dimension_numbers<[1], [1], [0], [0], [0, 0, 1, 0], [], []>} : vector<8x8xf32>, vector<8x8xf32>, vector<8x8xf32> -> vector<8x8xf32>
    %cst_16 = arith.constant dense<0xFF800000> : vector<8xf32>
    %31 = vector.multi_reduction <maximumf>, %30, %cst_16 [1] : vector<8x8xf32> to vector<8xf32>
    %32 = vector.shape_cast %31 : vector<8xf32> to vector<8x1xf32>
    %33 = vector.broadcast %32 : vector<8x1xf32> to vector<8x8xf32>
    %34 = arith.subf %30, %33 : vector<8x8xf32>
    %35 = math.exp %34 : vector<8x8xf32>
    %cst_17 = arith.constant dense<0.000000e+00> : vector<8xf32>
    %36 = vector.multi_reduction <add>, %35, %cst_17 [1] : vector<8x8xf32> to vector<8xf32>
    %37 = vector.shape_cast %36 : vector<8xf32> to vector<8x1xf32>
    %38 = tpu.reciprocal %37 {approx = true} : vector<8x1xf32> -> vector<8x1xf32>
    %39 = vector.broadcast %38 : vector<8x1xf32> to vector<8x8xf32>
    %40 = arith.mulf %35, %39 : vector<8x8xf32>
    %cst_18 = arith.constant dense<0.000000e+00> : vector<8x8xf32>
    %41 = tpu.matmul %40, %29, %cst_18 {dimension_numbers = #tpu.dot_dimension_numbers<[1], [0], [0], [1], [0, 0, 1, 1], [], []>} : vector<8x8xf32>, vector<8x8xf32>, vector<8x8xf32> -> vector<8x8xf32>
    %42 = vector.extract_strided_slice %6 {offsets = [0, 8], sizes = [32, 8], strides = [1, 1]} : vector<32x32xf32> to vector<32x8xf32>
    %cst_19 = arith.constant dense<0.000000e+00> : vector<8x32xf32>
    %43 = tpu.matmul %41, %42, %cst_19 {dimension_numbers = #tpu.dot_dimension_numbers<[1], [1], [0], [0], [0, 0, 1, 0], [], []>} : vector<8x8xf32>, vector<32x8xf32>, vector<8x32xf32> -> vector<8x32xf32>
    %44 = arith.addf %26, %43 : vector<8x32xf32>
    %45 = vector.extract_strided_slice %5 {offsets = [0, 16], sizes = [8, 8], strides = [1, 1]} : vector<16x96xf32> to vector<8x8xf32>
    %46 = vector.extract_strided_slice %5 {offsets = [0, 48], sizes = [8, 8], strides = [1, 1]} : vector<16x96xf32> to vector<8x8xf32>
    %47 = vector.extract_strided_slice %5 {offsets = [0, 80], sizes = [8, 8], strides = [1, 1]} : vector<16x96xf32> to vector<8x8xf32>
    %cst_20 = arith.constant dense<0.000000e+00> : vector<8x8xf32>
    %48 = tpu.matmul %45, %46, %cst_20 {dimension_numbers = #tpu.dot_dimension_numbers<[1], [1], [0], [0], [0, 0, 1, 0], [], []>} : vector<8x8xf32>, vector<8x8xf32>, vector<8x8xf32> -> vector<8x8xf32>
    %cst_21 = arith.constant dense<0xFF800000> : vector<8xf32>
    %49 = vector.multi_reduction <maximumf>, %48, %cst_21 [1] : vector<8x8xf32> to vector<8xf32>
    %50 = vector.shape_cast %49 : vector<8xf32> to vector<8x1xf32>
    %51 = vector.broadcast %50 : vector<8x1xf32> to vector<8x8xf32>
    %52 = arith.subf %48, %51 : vector<8x8xf32>
    %53 = math.exp %52 : vector<8x8xf32>
    %cst_22 = arith.constant dense<0.000000e+00> : vector<8xf32>
    %54 = vector.multi_reduction <add>, %53, %cst_22 [1] : vector<8x8xf32> to vector<8xf32>
    %55 = vector.shape_cast %54 : vector<8xf32> to vector<8x1xf32>
    %56 = tpu.reciprocal %55 {approx = true} : vector<8x1xf32> -> vector<8x1xf32>
    %57 = vector.broadcast %56 : vector<8x1xf32> to vector<8x8xf32>
    %58 = arith.mulf %53, %57 : vector<8x8xf32>
    %cst_23 = arith.constant dense<0.000000e+00> : vector<8x8xf32>
    %59 = tpu.matmul %58, %47, %cst_23 {dimension_numbers = #tpu.dot_dimension_numbers<[1], [0], [0], [1], [0, 0, 1, 1], [], []>} : vector<8x8xf32>, vector<8x8xf32>, vector<8x8xf32> -> vector<8x8xf32>
    %60 = vector.extract_strided_slice %6 {offsets = [0, 16], sizes = [32, 8], strides = [1, 1]} : vector<32x32xf32> to vector<32x8xf32>
    %cst_24 = arith.constant dense<0.000000e+00> : vector<8x32xf32>
    %61 = tpu.matmul %59, %60, %cst_24 {dimension_numbers = #tpu.dot_dimension_numbers<[1], [1], [0], [0], [0, 0, 1, 0], [], []>} : vector<8x8xf32>, vector<32x8xf32>, vector<8x32xf32> -> vector<8x32xf32>
    %62 = arith.addf %44, %61 : vector<8x32xf32>
    %63 = vector.extract_strided_slice %5 {offsets = [0, 24], sizes = [8, 8], strides = [1, 1]} : vector<16x96xf32> to vector<8x8xf32>
    %64 = vector.extract_strided_slice %5 {offsets = [0, 56], sizes = [8, 8], strides = [1, 1]} : vector<16x96xf32> to vector<8x8xf32>
    %65 = vector.extract_strided_slice %5 {offsets = [0, 88], sizes = [8, 8], strides = [1, 1]} : vector<16x96xf32> to vector<8x8xf32>
    %cst_25 = arith.constant dense<0.000000e+00> : vector<8x8xf32>
    %66 = tpu.matmul %63, %64, %cst_25 {dimension_numbers = #tpu.dot_dimension_numbers<[1], [1], [0], [0], [0, 0, 1, 0], [], []>} : vector<8x8xf32>, vector<8x8xf32>, vector<8x8xf32> -> vector<8x8xf32>
    %cst_26 = arith.constant dense<0xFF800000> : vector<8xf32>
    %67 = vector.multi_reduction <maximumf>, %66, %cst_26 [1] : vector<8x8xf32> to vector<8xf32>
    %68 = vector.shape_cast %67 : vector<8xf32> to vector<8x1xf32>
    %69 = vector.broadcast %68 : vector<8x1xf32> to vector<8x8xf32>
    %70 = arith.subf %66, %69 : vector<8x8xf32>
    %71 = math.exp %70 : vector<8x8xf32>
    %cst_27 = arith.constant dense<0.000000e+00> : vector<8xf32>
    %72 = vector.multi_reduction <add>, %71, %cst_27 [1] : vector<8x8xf32> to vector<8xf32>
    %73 = vector.shape_cast %72 : vector<8xf32> to vector<8x1xf32>
    %74 = tpu.reciprocal %73 {approx = true} : vector<8x1xf32> -> vector<8x1xf32>
    %75 = vector.broadcast %74 : vector<8x1xf32> to vector<8x8xf32>
    %76 = arith.mulf %71, %75 : vector<8x8xf32>
    %cst_28 = arith.constant dense<0.000000e+00> : vector<8x8xf32>
    %77 = tpu.matmul %76, %65, %cst_28 {dimension_numbers = #tpu.dot_dimension_numbers<[1], [0], [0], [1], [0, 0, 1, 1], [], []>} : vector<8x8xf32>, vector<8x8xf32>, vector<8x8xf32> -> vector<8x8xf32>
    %78 = vector.extract_strided_slice %6 {offsets = [0, 24], sizes = [32, 8], strides = [1, 1]} : vector<32x32xf32> to vector<32x8xf32>
    %cst_29 = arith.constant dense<0.000000e+00> : vector<8x32xf32>
    %79 = tpu.matmul %77, %78, %cst_29 {dimension_numbers = #tpu.dot_dimension_numbers<[1], [1], [0], [0], [0, 0, 1, 0], [], []>} : vector<8x8xf32>, vector<32x8xf32>, vector<8x32xf32> -> vector<8x32xf32>
    %80 = arith.addf %62, %79 : vector<8x32xf32>
    %81 = vector.broadcast %7 : vector<1x32xf32> to vector<8x32xf32>
    %82 = arith.addf %80, %81 : vector<8x32xf32>
    %83 = vector.extract_strided_slice %0 {offsets = [0, 0], sizes = [8, 32], strides = [1, 1]} : vector<16x32xf32> to vector<8x32xf32>
    %84 = arith.addf %82, %83 : vector<8x32xf32>
    %c0_30 = arith.constant 0 : index
    %c0_31 = arith.constant 0 : index
    %85 = vector.load %arg8[%c0_30, %c0_31] : memref<16x32xf32, #tpu.memory_space<vmem>>, vector<8x32xf32>
    tpu.vector_store %arg8[%c0_30, %c0_31], %84 {strides = array<i32>} : memref<16x32xf32, #tpu.memory_space<vmem>>, vector<8x32xf32>,
    %cst_32 = arith.constant 0.000000e+00 : f32
    %86 = vector.broadcast %cst_32 : f32 to vector<8x32xf32>
    %87 = vector.extract_strided_slice %5 {offsets = [8, 0], sizes = [8, 8], strides = [1, 1]} : vector<16x96xf32> to vector<8x8xf32>
    %88 = vector.extract_strided_slice %5 {offsets = [8, 32], sizes = [8, 8], strides = [1, 1]} : vector<16x96xf32> to vector<8x8xf32>
    %89 = vector.extract_strided_slice %5 {offsets = [8, 64], sizes = [8, 8], strides = [1, 1]} : vector<16x96xf32> to vector<8x8xf32>
    %cst_33 = arith.constant dense<0.000000e+00> : vector<8x8xf32>
    %90 = tpu.matmul %87, %88, %cst_33 {dimension_numbers = #tpu.dot_dimension_numbers<[1], [1], [0], [0], [0, 0, 1, 0], [], []>} : vector<8x8xf32>, vector<8x8xf32>, vector<8x8xf32> -> vector<8x8xf32>
    %cst_34 = arith.constant dense<0xFF800000> : vector<8xf32>
    %91 = vector.multi_reduction <maximumf>, %90, %cst_34 [1] : vector<8x8xf32> to vector<8xf32>
    %92 = vector.shape_cast %91 : vector<8xf32> to vector<8x1xf32>
    %93 = vector.broadcast %92 : vector<8x1xf32> to vector<8x8xf32>
    %94 = arith.subf %90, %93 : vector<8x8xf32>
    %95 = math.exp %94 : vector<8x8xf32>
    %cst_35 = arith.constant dense<0.000000e+00> : vector<8xf32>
    %96 = vector.multi_reduction <add>, %95, %cst_35 [1] : vector<8x8xf32> to vector<8xf32>
    %97 = vector.shape_cast %96 : vector<8xf32> to vector<8x1xf32>
    %98 = tpu.reciprocal %97 {approx = true} : vector<8x1xf32> -> vector<8x1xf32>
    %99 = vector.broadcast %98 : vector<8x1xf32> to vector<8x8xf32>
    %100 = arith.mulf %95, %99 : vector<8x8xf32>
    %cst_36 = arith.constant dense<0.000000e+00> : vector<8x8xf32>
    %101 = tpu.matmul %100, %89, %cst_36 {dimension_numbers = #tpu.dot_dimension_numbers<[1], [0], [0], [1], [0, 0, 1, 1], [], []>} : vector<8x8xf32>, vector<8x8xf32>, vector<8x8xf32> -> vector<8x8xf32>
    %102 = vector.extract_strided_slice %6 {offsets = [0, 0], sizes = [32, 8], strides = [1, 1]} : vector<32x32xf32> to vector<32x8xf32>
    %cst_37 = arith.constant dense<0.000000e+00> : vector<8x32xf32>
    %103 = tpu.matmul %101, %102, %cst_37 {dimension_numbers = #tpu.dot_dimension_numbers<[1], [1], [0], [0], [0, 0, 1, 0], [], []>} : vector<8x8xf32>, vector<32x8xf32>, vector<8x32xf32> -> vector<8x32xf32>
    %104 = arith.addf %86, %103 : vector<8x32xf32>
    %105 = vector.extract_strided_slice %5 {offsets = [8, 8], sizes = [8, 8], strides = [1, 1]} : vector<16x96xf32> to vector<8x8xf32>
    %106 = vector.extract_strided_slice %5 {offsets = [8, 40], sizes = [8, 8], strides = [1, 1]} : vector<16x96xf32> to vector<8x8xf32>
    %107 = vector.extract_strided_slice %5 {offsets = [8, 72], sizes = [8, 8], strides = [1, 1]} : vector<16x96xf32> to vector<8x8xf32>
    %cst_38 = arith.constant dense<0.000000e+00> : vector<8x8xf32>
    %108 = tpu.matmul %105, %106, %cst_38 {dimension_numbers = #tpu.dot_dimension_numbers<[1], [1], [0], [0], [0, 0, 1, 0], [], []>} : vector<8x8xf32>, vector<8x8xf32>, vector<8x8xf32> -> vector<8x8xf32>
    %cst_39 = arith.constant dense<0xFF800000> : vector<8xf32>
    %109 = vector.multi_reduction <maximumf>, %108, %cst_39 [1] : vector<8x8xf32> to vector<8xf32>
    %110 = vector.shape_cast %109 : vector<8xf32> to vector<8x1xf32>
    %111 = vector.broadcast %110 : vector<8x1xf32> to vector<8x8xf32>
    %112 = arith.subf %108, %111 : vector<8x8xf32>
    %113 = math.exp %112 : vector<8x8xf32>
    %cst_40 = arith.constant dense<0.000000e+00> : vector<8xf32>
    %114 = vector.multi_reduction <add>, %113, %cst_40 [1] : vector<8x8xf32> to vector<8xf32>
    %115 = vector.shape_cast %114 : vector<8xf32> to vector<8x1xf32>
    %116 = tpu.reciprocal %115 {approx = true} : vector<8x1xf32> -> vector<8x1xf32>
    %117 = vector.broadcast %116 : vector<8x1xf32> to vector<8x8xf32>
    %118 = arith.mulf %113, %117 : vector<8x8xf32>
    %cst_41 = arith.constant dense<0.000000e+00> : vector<8x8xf32>
    %119 = tpu.matmul %118, %107, %cst_41 {dimension_numbers = #tpu.dot_dimension_numbers<[1], [0], [0], [1], [0, 0, 1, 1], [], []>} : vector<8x8xf32>, vector<8x8xf32>, vector<8x8xf32> -> vector<8x8xf32>
    %120 = vector.extract_strided_slice %6 {offsets = [0, 8], sizes = [32, 8], strides = [1, 1]} : vector<32x32xf32> to vector<32x8xf32>
    %cst_42 = arith.constant dense<0.000000e+00> : vector<8x32xf32>
    %121 = tpu.matmul %119, %120, %cst_42 {dimension_numbers = #tpu.dot_dimension_numbers<[1], [1], [0], [0], [0, 0, 1, 0], [], []>} : vector<8x8xf32>, vector<32x8xf32>, vector<8x32xf32> -> vector<8x32xf32>
    %122 = arith.addf %104, %121 : vector<8x32xf32>
    %123 = vector.extract_strided_slice %5 {offsets = [8, 16], sizes = [8, 8], strides = [1, 1]} : vector<16x96xf32> to vector<8x8xf32>
    %124 = vector.extract_strided_slice %5 {offsets = [8, 48], sizes = [8, 8], strides = [1, 1]} : vector<16x96xf32> to vector<8x8xf32>
    %125 = vector.extract_strided_slice %5 {offsets = [8, 80], sizes = [8, 8], strides = [1, 1]} : vector<16x96xf32> to vector<8x8xf32>
    %cst_43 = arith.constant dense<0.000000e+00> : vector<8x8xf32>
    %126 = tpu.matmul %123, %124, %cst_43 {dimension_numbers = #tpu.dot_dimension_numbers<[1], [1], [0], [0], [0, 0, 1, 0], [], []>} : vector<8x8xf32>, vector<8x8xf32>, vector<8x8xf32> -> vector<8x8xf32>
    %cst_44 = arith.constant dense<0xFF800000> : vector<8xf32>
    %127 = vector.multi_reduction <maximumf>, %126, %cst_44 [1] : vector<8x8xf32> to vector<8xf32>
    %128 = vector.shape_cast %127 : vector<8xf32> to vector<8x1xf32>
    %129 = vector.broadcast %128 : vector<8x1xf32> to vector<8x8xf32>
    %130 = arith.subf %126, %129 : vector<8x8xf32>
    %131 = math.exp %130 : vector<8x8xf32>
    %cst_45 = arith.constant dense<0.000000e+00> : vector<8xf32>
    %132 = vector.multi_reduction <add>, %131, %cst_45 [1] : vector<8x8xf32> to vector<8xf32>
    %133 = vector.shape_cast %132 : vector<8xf32> to vector<8x1xf32>
    %134 = tpu.reciprocal %133 {approx = true} : vector<8x1xf32> -> vector<8x1xf32>
    %135 = vector.broadcast %134 : vector<8x1xf32> to vector<8x8xf32>
    %136 = arith.mulf %131, %135 : vector<8x8xf32>
    %cst_46 = arith.constant dense<0.000000e+00> : vector<8x8xf32>
    %137 = tpu.matmul %136, %125, %cst_46 {dimension_numbers = #tpu.dot_dimension_numbers<[1], [0], [0], [1], [0, 0, 1, 1], [], []>} : vector<8x8xf32>, vector<8x8xf32>, vector<8x8xf32> -> vector<8x8xf32>
    %138 = vector.extract_strided_slice %6 {offsets = [0, 16], sizes = [32, 8], strides = [1, 1]} : vector<32x32xf32> to vector<32x8xf32>
    %cst_47 = arith.constant dense<0.000000e+00> : vector<8x32xf32>
    %139 = tpu.matmul %137, %138, %cst_47 {dimension_numbers = #tpu.dot_dimension_numbers<[1], [1], [0], [0], [0, 0, 1, 0], [], []>} : vector<8x8xf32>, vector<32x8xf32>, vector<8x32xf32> -> vector<8x32xf32>
    %140 = arith.addf %122, %139 : vector<8x32xf32>
    %141 = vector.extract_strided_slice %5 {offsets = [8, 24], sizes = [8, 8], strides = [1, 1]} : vector<16x96xf32> to vector<8x8xf32>
    %142 = vector.extract_strided_slice %5 {offsets = [8, 56], sizes = [8, 8], strides = [1, 1]} : vector<16x96xf32> to vector<8x8xf32>
    %143 = vector.extract_strided_slice %5 {offsets = [8, 88], sizes = [8, 8], strides = [1, 1]} : vector<16x96xf32> to vector<8x8xf32>
    %cst_48 = arith.constant dense<0.000000e+00> : vector<8x8xf32>
    %144 = tpu.matmul %141, %142, %cst_48 {dimension_numbers = #tpu.dot_dimension_numbers<[1], [1], [0], [0], [0, 0, 1, 0], [], []>} : vector<8x8xf32>, vector<8x8xf32>, vector<8x8xf32> -> vector<8x8xf32>
    %cst_49 = arith.constant dense<0xFF800000> : vector<8xf32>
    %145 = vector.multi_reduction <maximumf>, %144, %cst_49 [1] : vector<8x8xf32> to vector<8xf32>
    %146 = vector.shape_cast %145 : vector<8xf32> to vector<8x1xf32>
    %147 = vector.broadcast %146 : vector<8x1xf32> to vector<8x8xf32>
    %148 = arith.subf %144, %147 : vector<8x8xf32>
    %149 = math.exp %148 : vector<8x8xf32>
    %cst_50 = arith.constant dense<0.000000e+00> : vector<8xf32>
    %150 = vector.multi_reduction <add>, %149, %cst_50 [1] : vector<8x8xf32> to vector<8xf32>
    %151 = vector.shape_cast %150 : vector<8xf32> to vector<8x1xf32>
    %152 = tpu.reciprocal %151 {approx = true} : vector<8x1xf32> -> vector<8x1xf32>
    %153 = vector.broadcast %152 : vector<8x1xf32> to vector<8x8xf32>
    %154 = arith.mulf %149, %153 : vector<8x8xf32>
    %cst_51 = arith.constant dense<0.000000e+00> : vector<8x8xf32>
    %155 = tpu.matmul %154, %143, %cst_51 {dimension_numbers = #tpu.dot_dimension_numbers<[1], [0], [0], [1], [0, 0, 1, 1], [], []>} : vector<8x8xf32>, vector<8x8xf32>, vector<8x8xf32> -> vector<8x8xf32>
    %156 = vector.extract_strided_slice %6 {offsets = [0, 24], sizes = [32, 8], strides = [1, 1]} : vector<32x32xf32> to vector<32x8xf32>
    %cst_52 = arith.constant dense<0.000000e+00> : vector<8x32xf32>
    %157 = tpu.matmul %155, %156, %cst_52 {dimension_numbers = #tpu.dot_dimension_numbers<[1], [1], [0], [0], [0, 0, 1, 0], [], []>} : vector<8x8xf32>, vector<32x8xf32>, vector<8x32xf32> -> vector<8x32xf32>
    %158 = arith.addf %140, %157 : vector<8x32xf32>
    %159 = vector.broadcast %7 : vector<1x32xf32> to vector<8x32xf32>
    %160 = arith.addf %158, %159 : vector<8x32xf32>
    %161 = vector.extract_strided_slice %0 {offsets = [8, 0], sizes = [8, 32], strides = [1, 1]} : vector<16x32xf32> to vector<8x32xf32>
    %162 = arith.addf %160, %161 : vector<8x32xf32>
    %c8 = arith.constant 8 : index
    %c0_53 = arith.constant 0 : index
    %163 = vector.load %arg8[%c8, %c0_53] : memref<16x32xf32, #tpu.memory_space<vmem>>, vector<8x32xf32>
    tpu.vector_store %arg8[%c8, %c0_53], %162 {strides = array<i32>} : memref<16x32xf32, #tpu.memory_space<vmem>>, vector<8x32xf32>,
    %c0_54 = arith.constant 0 : index
    %c0_55 = arith.constant 0 : index
    %164 = vector.load %arg8[%c0_54, %c0_55] : memref<16x32xf32, #tpu.memory_space<vmem>>, vector<16x32xf32>
    %c0_56 = arith.constant 0 : index
    %c0_57 = arith.constant 0 : index
    %165 = vector.load %arg6[%c0_56, %c0_57] : memref<32x32xf32, #tpu.memory_space<vmem>>, vector<32x32xf32>
    %cst_58 = arith.constant dense<0.000000e+00> : vector<16x32xf32>
    %166 = tpu.matmul %164, %165, %cst_58 {dimension_numbers = #tpu.dot_dimension_numbers<[1], [1], [0], [0], [0, 0, 1, 0], [], []>} : vector<16x32xf32>, vector<32x32xf32>, vector<16x32xf32> -> vector<16x32xf32>
    %167 = arith.addf %166, %164 : vector<16x32xf32>
    %c0_59 = arith.constant 0 : index
    %c0_60 = arith.constant 0 : index
    %168 = vector.load %arg7[%c0_59, %c0_60] : memref<16x32xf32, #tpu.memory_space<vmem>>, vector<16x32xf32>
    tpu.vector_store %arg7[%c0_59, %c0_60], %167 {strides = array<i32>} : memref<16x32xf32, #tpu.memory_space<vmem>>, vector<16x32xf32>,
    return
  }
  func.func @transform_0(%arg0: i32) -> (i32, i32) {
    %c0_i32 = arith.constant 0 : i32
    %c0_i32_0 = arith.constant 0 : i32
    return %arg0, %c0_i32 : i32, i32
  }
  func.func @transform_1(%arg0: i32) -> (i32, i32) {
    %c0_i32 = arith.constant 0 : i32
    %c0_i32_0 = arith.constant 0 : i32
    %c0_i32_1 = arith.constant 0 : i32
    return %c0_i32, %c0_i32_0 : i32, i32
  }
  func.func @transform_2(%arg0: i32) -> (i32, i32) {
    %c0_i32 = arith.constant 0 : i32
    %c0_i32_0 = arith.constant 0 : i32
    %c0_i32_1 = arith.constant 0 : i32
    return %c0_i32, %c0_i32_0 : i32, i32
  }
  func.func @transform_3(%arg0: i32) -> (i32, i32) {
    %c0_i32 = arith.constant 0 : i32
    %c0_i32_0 = arith.constant 0 : i32
    %c0_i32_1 = arith.constant 0 : i32
    return %c0_i32, %c0_i32_0 : i32, i32
  }
  func.func @transform_4(%arg0: i32) -> (i32, i32) {
    %c0_i32 = arith.constant 0 : i32
    %c0_i32_0 = arith.constant 0 : i32
    %c0_i32_1 = arith.constant 0 : i32
    return %c0_i32, %c0_i32_0 : i32, i32
  }
  func.func @transform_5(%arg0: i32) -> (i32, i32) {
    %c0_i32 = arith.constant 0 : i32
    %c0_i32_0 = arith.constant 0 : i32
    %c0_i32_1 = arith.constant 0 : i32
    return %c0_i32, %c0_i32_0 : i32, i32
  }
  func.func @transform_6(%arg0: i32) -> (i32, i32) {
    %c0_i32 = arith.constant 0 : i32
    %c0_i32_0 = arith.constant 0 : i32
    return %arg0, %c0_i32 : i32, i32
  }
}

</mosaic_0001>

<bundles_post_ra>
// kernel: tpu_custom_call.1
= control target key start
LH: loop header
LB: loop body
LE: loop exit
PB: predicated region body
PF: predicated region fallthrough
CT: control target
= control target key end

     0   :  { %vm45_vm0 = vcmask 261120   ;;  %s3324_s0 = inlined_call_operand.vmem [shape: f32[16,32], index: 0, kind: input, shape index: {}]   ;;  %s3325_s1 = inlined_call_operand.vmem [shape: f32[96,32], index: 1, kind: input, shape index: {}]   ;;  %s3326_s2 = inlined_call_operand.vmem [shape: f32[1,96], index: 2, kind: input, shape index: {}]   ;;  %s3327_s3 = inlined_call_operand.vmem [shape: f32[32,32], index: 3, kind: input, shape index: {}]   ;;  %s3328_s4 = inlined_call_operand.vmem [shape: f32[1,32], index: 4, kind: input, shape index: {}]   ;;  %s3329_s5 = inlined_call_operand.vmem [shape: f32[32,32], index: 5, kind: input, shape index: {}]   ;;  %s3330_s6 = inlined_call_operand.hbm [shape: f32[16,32], index: 6, kind: output, shape index: {}]  }
   0x1   :  { %v26_v0 = vld [vmem:[%s3325_s1] sm:$0xff]  ;;  %v27_v1 = vld [vmem:[%s3325_s1 + $0x8] sm:$0xff]  ;;  %v28_v2 = vld [vmem:[%s3325_s1 + $0x10] sm:$0xff] }
   0x2   :  { %v2648_v3 = vpack.c.bf16 %v27_v1, %v26_v0  ;;  %vm2926_vm1 = vmpackc.low %vm45_vm0, %vm45_vm0  ;;  %v29_v5 = vld [vmem:[%s3325_s1 + $0x18] sm:$0xff]  ;;  %v2940_v7 = vld [vmem:[%s3324_s0] sm:$0xff] }
   0x3   :  { %v2654_v6 = vpack.c.bf16 %v29_v5, %v28_v2  ;;  %2466 = vmatprep.mubr.msk.f32.mxu0 %vm45_vm0, %v2940_v7 }
   0x4   :  { %2650 = vmatprep.subr.msk.bf16.mxu0 %vm2926_vm1, %v2648_v3 }
   0x5   :  { %2653 = vmatpush3.bf16.xpose.msk.msra.mxu0 %vm2926_vm1, %v2648_v3 }
   0x6   :  { %2656 = vmatprep.subr.msk.bf16.mxu0 %vm2926_vm1, %v2654_v6 }
   0x7   :  { %11 = vsyncpa [#allocation4], 0  ;;  %v30_v8 = vld [vmem:[%s3325_s1 + $0x20] sm:$0xff]  ;;  %v31_v9 = vld [vmem:[%s3325_s1 + $0x28] sm:$0xff]  ;;  %v2863_v21 = vmov 0.0   ;;  %vm2864_vm2 = vmmov 0  }
   0x8   :  { %v2660_v10 = vpack.c.bf16 %v31_v9, %v30_v8  ;;  %v32_v11 = vld [vmem:[%s3325_s1 + $0x30] sm:$0xff]  ;;  %v33_v12 = vld [vmem:[%s3325_s1 + $0x38] sm:$0xff]  ;;  %v34_v14 = vld [vmem:[%s3325_s1 + $0x40] sm:$0xff]  ;;  %2469 = vmatprep.subr.mxu1 %v2863_v21  ;;  %2471 = vmatprep.mubr.msk.f32.mxu1 %vm2864_vm2, %v2863_v21  ;;  %s2866_s26 = smov 96   ;;  %s2867_s27 = smov 88   ;;  %vm171_vm3 = vcmask 64512  }
   0x9   :  { %v2666_v13 = vpack.c.bf16 %v33_v12, %v32_v11  ;;  %v35_v15 = vld [vmem:[%s3325_s1 + $0x48] sm:$0xff]  ;;  %v36_v17 = vld [vmem:[%s3325_s1 + $0x50] sm:$0xff]  ;;  %v37_v18 = vld [vmem:[%s3325_s1 + $0x58] sm:$0xff]  ;;  %s2869_s28 = smov 80   ;;  %s2870_s9 = smov 56   ;;  %v2871_v58 = vmov 0.0|0.0  }
   0xa   :  { %v2672_v16 = vpack.c.bf16 %v35_v15, %v34_v14  ;;  %v2678_v19 = vpack.c.bf16 %v37_v18, %v36_v17  ;;  %v2991_v20 = vld [vmem:[%s3324_s0 + $0x8] sm:$0xff]  ;;  %v2264_v22 = vld [vmem:[%s3326_s2] ss:$0 sm:$0xff]  ;;  %s2865_s0 = smov 64   ;;  %s2868_s2 = smov 120   ;;  %v165_v55 = vld [vmem:[%s3327_s3 + $0x10] sm:$0xff] }
   0xb   :  { %v163_v52 = vld [vmem:[%s3327_s3] sm:$0xff]  ;;  %v164_v53 = vld [vmem:[%s3327_s3 + $0x8] sm:$0xff]  ;;  %v166_v56 = vld [vmem:[%s3327_s3 + $0x18] sm:$0xff]  ;;  %s2872_s14 = smov 112   ;;  %s2873_s3 = smov 48  }
   0xc   :  { %v3044_v54 = vpack.i.bf16 %v164_v53, %v163_v52  ;;  %v3054_v57 = vpack.i.bf16 %v166_v56, %v165_v55  ;;  %vm3066_vm4 = vmpackc.low %vm171_vm3, %vm171_vm3  ;;  %s2874_s15 = smov 72   ;;  %s2875_s16 = smov 104   ;;  %v2151_v3 = vld [vmem:[%s3329_s5 + $0x10] sm:$0xff] }
   0xd   :  { %2659 = vmatpush3.bf16.xpose.msk.msra.mxu0 %vm2926_vm1, %v2654_v6  ;;  %s2876_s17 = smov 40  }
   0xe   :  { %2662 = vmatprep.subr.msk.bf16.mxu0 %vm2926_vm1, %v2660_v10 }
  0x15   :  { %2665 = vmatpush3.bf16.xpose.msk.msra.mxu0 %vm2926_vm1, %v2660_v10  ;;  %v3083_v10 = vpack.c.bf16 %v164_v53, %v163_v52 }
  0x16   :  { %2668 = vmatprep.subr.msk.bf16.mxu0 %vm2926_vm1, %v2666_v13 }
  0x1d   :  { %2671 = vmatpush3.bf16.xpose.msk.msra.mxu0 %vm2926_vm1, %v2666_v13  ;;  %v3092_v13 = vpack.c.bf16 %v166_v56, %v165_v55 }
  0x1e   :  { %2674 = vmatprep.subr.msk.bf16.mxu0 %vm2926_vm1, %v2672_v16 }
  0x25   :  { %2677 = vmatpush3.bf16.xpose.msk.msra.mxu0 %vm2926_vm1, %v2672_v16 }
  0x26   :  { %2680 = vmatprep.subr.msk.bf16.mxu0 %vm2926_vm1, %v2678_v19 }
  0x2d   :  { %2683 = vmatpush3.bf16.xpose.msk.msra.mxu0 %vm2926_vm1, %v2678_v19 }
  0x2e   :  { %2700 = vmatprep.subr.bf16.mxu0 %v2871_v58 }
  0x34   :  { %2467 = vmatmul.mubr.msk.f32.vlgmr.msra.gmra.mrb[0].mxu0 %vm45_vm0, %v2991_v20 }
  0x35   :  { %2529 = vmatprep.mubr.msk.f32.mxu0 %vm2864_vm2, %v2863_v21 }
 0x107   :  { %v2468_v23 = vpop.f32.mrb[0].mxu0 }
 0x108   :  { %v3003_v24 = vadd.f32 %v2468_v23, %v2264_v22  ;;  %v154_v25 = vpop.f32.mrb[1].mxu0 }
 0x109   :  { %v3005_v26 = vadd.f32 %v2264_v22, %v154_v25 }
 0x10b   :  { %257 = vrot.lane.b32.xlu1 %v3005_v26, %s2865_s0  ;;  %169 = vrot.lane.b32.xlu0 %v3005_v26, %s2866_s26 }
 0x10f   :  { %335 = vrot.lane.b32.xlu1 %v3005_v26, %s2867_s27 }
 0x17d   :  { %v170_v27 = vpop.permute.xlu0 %169  ;;  %v258_v28 = vpop.permute.xlu1 %257 }
 0x17e   :  { %2470 = vmatpush3.xpose.msk.msra.mxu1 %vm171_vm3, %v170_v27 }
 0x17f   :  { %2474 = vmatprep.subr.mxu1 %v2863_v21 }
 0x181   :  { %2472 = vmatmul.mubr.msk.f32.vlgmr.msra.gmra.mrb[0].mxu1 %vm171_vm3, %v3005_v26  ;;  %v336_v37 = vpop.permute.xlu1 %335 }
 0x182   :  { %2475 = vmatpush3.msra.mxu1 %v258_v28  ;;  %2476 = vmatprep.mubr.msk.f32.mxu1 %vm2864_vm2, %v2863_v21 }
 0x183   :  { %2479 = vmatprep.subr.mxu1 %v2863_v21 }
 0x254   :  { %v242_v29 = vpop.f32.mrb[0].mxu1 }
 0x255   :  { %v2473_v30 = vpop.f32.mrb[1].mxu1  ;;  %v246_v31 = vsel %vm171_vm3, %v242_v29, -inf }
 0x256   :  { %247 = vmax.xlane.f32.xlu0 %v246_v31 }
 0x2e3   :  { %v248_v32 = vpop.xlane.xlu0 %247 }
 0x2e4   :  { %v249_v33 = vsub.f32 %v242_v29, %v248_v32 }
 0x2e6   :  { %v250_v34 = vmul.f32 1.442695, %v249_v33 }
 0x2e8   :  { %2807 = vpow2.f32 %v250_v34 }
 0x2f2   :  { %v2808_v35 = vpop.eup %2807 }
 0x2f3   :  { %v252_v36 = vsel %vm171_vm3, %v2808_v35, 0.0 }
 0x2f4   :  { %253 = vadd.xlane.f32.xlu1 %v252_v36 }
 0x305   :  { %333 = vrot.lane.b32.xlu1 %v3005_v26, %s2868_s2 }
 0x381   :  { %v254_v38 = vpop.xlane.xlu1 %253 }
 0x382   :  { %2809 = vrcp.f32 %v254_v38 }
 0x385   :  { %v334_v41 = vpop.permute.xlu1 %333 }
 0x38c   :  { %v2810_v39 = vpop.eup %2809 }
 0x38d   :  { %v256_v40 = vmul.f32 %v2810_v39, %v2808_v35 }
 0x38f   :  { %2477 = vmatmul.mubr.msk.f32.vlgmr.msra.gmra.mrb[2].mxu1 %vm171_vm3, %v256_v40 }
 0x390   :  { %2480 = vmatpush3.xpose.msk.msra.mxu1 %vm171_vm3, %v336_v37  ;;  %2481 = vmatprep.mubr.msk.f32.mxu1 %vm2864_vm2, %v2863_v21 }
 0x391   :  { %2484 = vmatprep.subr.mxu1 %v2863_v21 }
 0x393   :  { %2482 = vmatmul.mubr.msk.f32.vlgmr.msra.gmra.mrb[4].mxu1 %vm171_vm3, %v334_v41 }
 0x394   :  { %2486 = vmatprep.mubr.msk.f32.mxu1 %vm2864_vm2, %v2863_v21 }
 0x462   :  { %v329_v42 = vpop.f32.mrb[2].mxu1 }
 0x463   :  { %v2478_v43 = vpop.f32.mrb[3].mxu1 }
 0x466   :  { %v407_v44 = vpop.f32.mrb[4].mxu1 }
 0x467   :  { %v2483_v45 = vpop.f32.mrb[5].mxu1  ;;  %v411_v46 = vsel %vm171_vm3, %v407_v44, -inf }
 0x468   :  { %412 = vmax.xlane.f32.xlu1 %v411_v46 }
 0x479   :  { %674 = vrot.lane.b32.xlu1 %v3005_v26, %s2869_s28 }
 0x4f5   :  { %v413_v47 = vpop.xlane.xlu1 %412 }
 0x4f6   :  { %v414_v48 = vsub.f32 %v407_v44, %v413_v47 }
 0x4f8   :  { %v415_v49 = vmul.f32 1.442695, %v414_v48 }
 0x4f9   :  { %v675_v14 = vpop.permute.xlu1 %674 }
 0x4fa   :  { %2811 = vpow2.f32 %v415_v49 }
 0x504   :  { %v2812_v50 = vpop.eup %2811 }
 0x505   :  { %v417_v51 = vsel %vm171_vm3, %v2812_v50, 0.0 }
 0x506   :  { %418 = vadd.xlane.f32.xlu0 %v417_v51 }
 0x51c   :  { %422 = vrot.lane.b32.xlu0 %v3005_v26, %s2870_s9 }
 0x520   :  { %2778 = vrot.lane.b32.xlu0 %v3044_v54, %s2868_s2 }
 0x524   :  { %2783 = vrot.lane.b32.xlu0 %v3054_v57, %s2868_s2 }
 0x528   :  { %672 = vrot.lane.b32.xlu0 %v3005_v26, %s2872_s14 }
 0x593   :  { %v419_v59 = vpop.xlane.xlu0 %418 }
 0x594   :  { %2813 = vrcp.f32 %v419_v59 }
 0x597   :  { %v423_v60 = vpop.permute.xlu0 %422 }
 0x598   :  { %2485 = vmatpush3.msra.mxu1 %v423_v60 }
 0x599   :  { %2684 = vmatprep.subr.bf16.mxu1 %v2871_v58 }
 0x59b   :  { %v2779_v61 = vpop.permute.xlu0 %2778 }
 0x59c   :  { %v2781_v62 = vunpack.i.h.bf16 %v2779_v61  ;;  %v2780_v63 = vunpack.i.l.bf16 %v2779_v61 }
 0x59e   :  { %v2814_v0 = vpop.eup %2813  ;;  %v3062_v1 = vpack.c.bf16 %v2781_v62, %v2780_v63 }
 0x59f   :  { %v421_v2 = vmul.f32 %v2814_v0, %v2812_v50  ;;  %v2784_v5 = vpop.permute.xlu0 %2783 }
 0x5a0   :  { %v2786_v6 = vunpack.i.h.bf16 %v2784_v5  ;;  %v2785_v8 = vunpack.i.l.bf16 %v2784_v5 }
 0x5a1   :  { %2487 = vmatmul.mubr.msk.f32.vlgmr.msra.gmra.mrb[6].mxu1 %vm171_vm3, %v421_v2 }
 0x5a2   :  { %2687 = vmatpush3.bf16.xpose.msk.msra.mxu1 %vm3066_vm4, %v3062_v1  ;;  %2497 = vmatprep.mubr.msk.f32.mxu1 %vm2864_vm2, %v2863_v21  ;;  %v3077_v9 = vpack.c.bf16 %v2786_v6, %v2785_v8 }
 0x5a3   :  { %2688 = vmatprep.subr.bf16.mxu1 %v2871_v58  ;;  %v673_v15 = vpop.permute.xlu0 %672 }
 0x5aa   :  { %2691 = vmatpush3.bf16.xpose.msk.msra.mxu1 %vm3066_vm4, %v3077_v9 }
 0x5ab   :  { %2692 = vmatprep.subr.bf16.mxu1 %v2871_v58 }
 0x674   :  { %v494_v11 = vpop.f32.mrb[6].mxu1 }
 0x675   :  { %v2488_v12 = vpop.f32.mrb[7].mxu1  ;;  %2498 = vmatmul.mubr.msk.f32.vlgmr.msra.gmra.mrb[8].mxu1 %vm171_vm3, %v494_v11 }
 0x676   :  { %2695 = vmatpush3.bf16.xpose.msk.msra.mxu1 %vm3066_vm4, %v3083_v10  ;;  %2508 = vmatprep.mubr.msk.f32.mxu1 %vm2864_vm2, %v2863_v21 }
 0x677   :  { %2696 = vmatprep.subr.bf16.mxu1 %v2871_v58 }
 0x67e   :  { %2699 = vmatpush3.bf16.xpose.msk.msra.mxu1 %vm3066_vm4, %v3092_v13 }
 0x67f   :  { %2511 = vmatprep.subr.mxu1 %v2863_v21 }
 0x685   :  { %2509 = vmatmul.mubr.msk.f32.vlgmr.msra.gmra.mrb[10].mxu1 %vm171_vm3, %v329_v42 }
 0x686   :  { %2512 = vmatpush3.xpose.msk.msra.mxu1 %vm171_vm3, %v675_v14  ;;  %2513 = vmatprep.mubr.msk.f32.mxu1 %vm2864_vm2, %v2863_v21 }
 0x687   :  { %2516 = vmatprep.subr.mxu1 %v2863_v21 }
 0x689   :  { %2514 = vmatmul.mubr.msk.f32.vlgmr.msra.gmra.mrb[12].mxu1 %vm171_vm3, %v673_v15 }
 0x68a   :  { %2518 = vmatprep.mubr.msk.f32.mxu1 %vm2864_vm2, %v2863_v21 }
 0x748   :  { %v587_v16 = vpop.f32.mrb[8].mxu1 }
 0x749   :  { %v2499_v17 = vpop.f32.mrb[9].mxu1 }
 0x758   :  { %v668_v18 = vpop.f32.mrb[10].mxu1 }
 0x759   :  { %v669_v19 = vadd.f32 %v668_v18, %v587_v16  ;;  %v2510_v22 = vpop.f32.mrb[11].mxu1 }
 0x75c   :  { %v746_v23 = vpop.f32.mrb[12].mxu1 }
 0x75d   :  { %v2515_v25 = vpop.f32.mrb[13].mxu1  ;;  %v750_v27 = vsel %vm171_vm3, %v746_v23, -inf }
 0x75e   :  { %751 = vmax.xlane.f32.xlu0 %v750_v27 }
 0x774   :  { %761 = vrot.lane.b32.xlu0 %v3005_v26, %s2873_s3 }
 0x778   :  { %2793 = vrot.lane.b32.xlu0 %v3054_v57, %s2872_s14 }
 0x77c   :  { %1192 = vrot.lane.b32.xlu0 %v3003_v24, %s2866_s26 }
 0x780   :  { %929 = vrot.lane.b32.xlu0 %v3005_v26, %s2874_s15 }
 0x7eb   :  { %v752_v28 = vpop.xlane.xlu0 %751 }
 0x7ec   :  { %v753_v29 = vsub.f32 %v746_v23, %v752_v28 }
 0x7ee   :  { %v754_v30 = vmul.f32 1.442695, %v753_v29 }
 0x7ef   :  { %v762_v31 = vpop.permute.xlu0 %761 }
 0x7f0   :  { %2815 = vpow2.f32 %v754_v30  ;;  %2517 = vmatpush3.msra.mxu1 %v762_v31 }
 0x7f1   :  { %2532 = vmatprep.subr.mxu1 %v2863_v21 }
 0x7f3   :  { %v2794_v35 = vpop.permute.xlu0 %2793 }
 0x7f4   :  { %v2796_v41 = vunpack.i.h.bf16 %v2794_v35  ;;  %v2795_v42 = vunpack.i.l.bf16 %v2794_v35 }
 0x7f6   :  { %v3127_v45 = vpack.c.bf16 %v2796_v41, %v2795_v42 }
 0x7f7   :  { %v1193_v40 = vpop.permute.xlu0 %1192 }
 0x7fa   :  { %v2816_v32 = vpop.eup %2815 }
 0x7fb   :  { %v756_v33 = vsel %vm171_vm3, %v2816_v32, 0.0  ;;  %v930_v46 = vpop.permute.xlu0 %929 }
 0x7fc   :  { %757 = vadd.xlane.f32.xlu1 %v756_v33 }
 0x80d   :  { %2788 = vrot.lane.b32.xlu1 %v3044_v54, %s2872_s14 }
 0x811   :  { %927 = vrot.lane.b32.xlu1 %v3005_v26, %s2875_s16 }
 0x889   :  { %v758_v34 = vpop.xlane.xlu1 %757 }
 0x88a   :  { %2817 = vrcp.f32 %v758_v34 }
 0x88d   :  { %v2789_v36 = vpop.permute.xlu1 %2788 }
 0x88e   :  { %v2791_v37 = vunpack.i.h.bf16 %v2789_v36  ;;  %v2790_v38 = vunpack.i.l.bf16 %v2789_v36 }
 0x890   :  { %v3121_v39 = vpack.c.bf16 %v2791_v37, %v2790_v38 }
 0x891   :  { %v928_v47 = vpop.permute.xlu1 %927 }
 0x892   :  { %2703 = vmatpush3.bf16.xpose.msk.msra.mxu0 %vm3066_vm4, %v3121_v39 }
 0x893   :  { %2704 = vmatprep.subr.bf16.mxu0 %v2871_v58 }
 0x894   :  { %v2818_v43 = vpop.eup %2817 }
 0x895   :  { %v760_v44 = vmul.f32 %v2818_v43, %v2816_v32 }
 0x897   :  { %2519 = vmatmul.mubr.msk.f32.vlgmr.msra.gmra.mrb[14].mxu1 %vm171_vm3, %v760_v44 }
 0x898   :  { %2533 = vmatpush3.xpose.msk.msra.mxu1 %vm171_vm3, %v930_v46  ;;  %2534 = vmatprep.mubr.msk.f32.mxu1 %vm2864_vm2, %v2863_v21 }
 0x899   :  { %2537 = vmatprep.subr.mxu1 %v2863_v21 }
 0x89a   :  { %2707 = vmatpush3.bf16.xpose.msk.msra.mxu0 %vm3066_vm4, %v3127_v45 }
 0x89b   :  { %2535 = vmatmul.mubr.msk.f32.vlgmr.msra.gmra.mrb[16].mxu1 %vm171_vm3, %v928_v47  ;;  %2553 = vmatprep.subr.mxu0 %v2863_v21 }
 0x89c   :  { %2539 = vmatprep.mubr.msk.f32.mxu1 %vm2864_vm2, %v2863_v21 }
 0x96a   :  { %v833_v48 = vpop.f32.mrb[14].mxu1 }
 0x96b   :  { %v2520_v49 = vpop.f32.mrb[15].mxu1  ;;  %2530 = vmatmul.mubr.msk.f32.vlgmr.msra.gmra.mrb[2].mxu0 %vm171_vm3, %v833_v48 }
 0x96c   :  { %2554 = vmatpush3.xpose.msk.msra.mxu0 %vm171_vm3, %v1193_v40  ;;  %2555 = vmatprep.mubr.msk.f32.mxu0 %vm2864_vm2, %v2863_v21 }
 0x96d   :  { %2558 = vmatprep.subr.mxu0 %v2863_v21 }
 0x96e   :  { %v1001_v50 = vpop.f32.mrb[16].mxu1 }
 0x96f   :  { %v2536_v51 = vpop.f32.mrb[17].mxu1  ;;  %2556 = vmatmul.mubr.msk.f32.vlgmr.msra.gmra.mrb[4].mxu0 %vm171_vm3, %v3003_v24  ;;  %v1005_v6 = vsel %vm171_vm3, %v1001_v50, -inf }
 0x970   :  { %2560 = vmatprep.mubr.msk.f32.mxu0 %vm2864_vm2, %v2863_v21 }
 0xa3e   :  { %v922_v52 = vpop.f32.mrb[2].mxu0 }
 0xa3f   :  { %v3150_v53 = vadd.f32 %v922_v52, %v669_v19  ;;  %v2531_v55 = vpop.f32.mrb[3].mxu0 }
 0xa42   :  { %v1264_v56 = vpop.f32.mrb[4].mxu0 }
 0xa43   :  { %v2557_v59 = vpop.f32.mrb[5].mxu0  ;;  %v1268_v60 = vsel %vm171_vm3, %v1264_v56, -inf }
 0xa44   :  { %1269 = vmax.xlane.f32.xlu0 %v1268_v60 }
 0xa5a   :  { %1279 = vrot.lane.b32.xlu0 %v3003_v24, %s2865_s0 }
 0xa5e   :  { %1355 = vrot.lane.b32.xlu0 %v3003_v24, %s2868_s2 }
 0xad1   :  { %v1270_v61 = vpop.xlane.xlu0 %1269 }
 0xad2   :  { %v1271_v62 = vsub.f32 %v1264_v56, %v1270_v61 }
 0xad4   :  { %v1272_v63 = vmul.f32 1.442695, %v1271_v62 }
 0xad5   :  { %v1280_v0 = vpop.permute.xlu0 %1279 }
 0xad6   :  { %2819 = vpow2.f32 %v1272_v63  ;;  %2559 = vmatpush3.msra.mxu0 %v1280_v0 }
 0xad7   :  { %2563 = vmatprep.subr.mxu0 %v2863_v21 }
 0xad9   :  { %v1356_v15 = vpop.permute.xlu0 %1355 }
 0xae0   :  { %v2820_v2 = vpop.eup %2819 }
 0xae1   :  { %v1274_v5 = vsel %vm171_vm3, %v2820_v2, 0.0 }
 0xae2   :  { %1275 = vadd.xlane.f32.xlu1 %v1274_v5 }
 0xaf3   :  { %1357 = vrot.lane.b32.xlu1 %v3003_v24, %s2867_s27 }
 0xb17   :  { %1006 = vmax.xlane.f32.xlu1 %v1005_v6 }
 0xb6f   :  { %v1276_v8 = vpop.xlane.xlu1 %1275 }
 0xb70   :  { %2821 = vrcp.f32 %v1276_v8 }
 0xb73   :  { %v1358_v14 = vpop.permute.xlu1 %1357 }
 0xb7a   :  { %v2822_v11 = vpop.eup %2821 }
 0xb7b   :  { %v1278_v12 = vmul.f32 %v2822_v11, %v2820_v2 }
 0xb7d   :  { %2561 = vmatmul.mubr.msk.f32.vlgmr.msra.gmra.mrb[6].mxu0 %vm171_vm3, %v1278_v12 }
 0xb7e   :  { %2564 = vmatpush3.xpose.msk.msra.mxu0 %vm171_vm3, %v1358_v14  ;;  %2565 = vmatprep.mubr.msk.f32.mxu0 %vm2864_vm2, %v2863_v21 }
 0xb7f   :  { %2716 = vmatprep.subr.bf16.mxu0 %v2871_v58 }
 0xb81   :  { %2566 = vmatmul.mubr.msk.f32.vlgmr.msra.gmra.mrb[8].mxu0 %vm171_vm3, %v1356_v15 }
 0xb82   :  { %2719 = vmatpush3.bf16.xpose.msk.msra.mxu0 %vm3066_vm4, %v3062_v1  ;;  %2581 = vmatprep.mubr.msk.f32.mxu0 %vm2864_vm2, %v2863_v21 }
 0xb83   :  { %2720 = vmatprep.subr.bf16.mxu0 %v2871_v58 }
 0xb8a   :  { %2723 = vmatpush3.bf16.xpose.msk.msra.mxu0 %vm3066_vm4, %v3077_v9 }
 0xb8b   :  { %2595 = vmatprep.subr.mxu0 %v2863_v21 }
 0xba4   :  { %v1007_v16 = vpop.xlane.xlu1 %1006 }
 0xba5   :  { %v1008_v17 = vsub.f32 %v1001_v50, %v1007_v16  ;;  %v3230_v50 = vld [vmem:[%s3328_s4] ss:$0 sm:$0xff] }
 0xba7   :  { %v1009_v18 = vmul.f32 1.442695, %v1008_v17 }
 0xba9   :  { %2823 = vpow2.f32 %v1009_v18 }
 0xbb3   :  { %v2824_v19 = vpop.eup %2823 }
 0xbb4   :  { %v1011_v22 = vsel %vm171_vm3, %v2824_v19, 0.0 }
 0xbb5   :  { %1012 = vadd.xlane.f32.xlu0 %v1011_v22 }
 0xbcb   :  { %1016 = vrot.lane.b32.xlu0 %v3005_v26, %s2876_s17 }
 0xbcf   :  { %2803 = vrot.lane.b32.xlu0 %v3054_v57, %s2875_s16 }
 0xbd3   :  { %1444 = vrot.lane.b32.xlu0 %v3003_v24, %s2870_s9 }
 0xbd7   :  { %1666 = vrot.lane.b32.xlu0 %v3003_v24, %s2872_s14 }
 0xc42   :  { %v1013_v1 = vpop.xlane.xlu0 %1012 }
 0xc43   :  { %2825 = vrcp.f32 %v1013_v1 }
 0xc46   :  { %v1017_v9 = vpop.permute.xlu0 %1016 }
 0xc47   :  { %2538 = vmatpush3.msra.mxu1 %v1017_v9 }
 0xc48   :  { %2708 = vmatprep.subr.bf16.mxu1 %v2871_v58 }
 0xc4a   :  { %v2804_v43 = vpop.permute.xlu0 %2803 }
 0xc4b   :  { %v2806_v44 = vunpack.i.h.bf16 %v2804_v43  ;;  %v2805_v46 = vunpack.i.l.bf16 %v2804_v43 }
 0xc4d   :  { %v2826_v23 = vpop.eup %2825 }
 0xc4e   :  { %v1015_v25 = vmul.f32 %v2826_v23, %v2824_v19  ;;  %v1445_v48 = vpop.permute.xlu0 %1444 }
 0xc50   :  { %2540 = vmatmul.mubr.msk.f32.vlgmr.msra.gmra.mrb[18].mxu1 %vm171_vm3, %v1015_v25  ;;  %v1351_v26 = vpop.f32.mrb[6].mxu0 }
 0xc51   :  { %v2562_v27 = vpop.f32.mrb[7].mxu0  ;;  %2550 = vmatprep.mubr.msk.f32.mxu1 %vm2864_vm2, %v2863_v21 }
 0xc54   :  { %v1429_v57 = vpop.f32.mrb[8].mxu0 }
 0xc55   :  { %v2567_v28 = vpop.f32.mrb[9].mxu0  ;;  %v1433_v29 = vsel %vm171_vm3, %v1429_v57, -inf }
 0xc56   :  { %1434 = vmax.xlane.f32.xlu1 %v1433_v29 }
 0xce3   :  { %v1435_v30 = vpop.xlane.xlu1 %1434 }
 0xce4   :  { %v1436_v31 = vsub.f32 %v1429_v57, %v1435_v30 }
 0xce6   :  { %v1437_v32 = vmul.f32 1.442695, %v1436_v31 }
 0xce8   :  { %2827 = vpow2.f32 %v1437_v32 }
 0xcf2   :  { %v2828_v33 = vpop.eup %2827 }
 0xcf3   :  { %v1439_v34 = vsel %vm171_vm3, %v2828_v33, 0.0 }
 0xcf4   :  { %1440 = vadd.xlane.f32.xlu1 %v1439_v34 }
 0xd05   :  { %2798 = vrot.lane.b32.xlu1 %v3044_v54, %s2875_s16  ;;  %v3203_v54 = vpack.c.bf16 %v2806_v44, %v2805_v46 }
 0xd09   :  { %1668 = vrot.lane.b32.xlu1 %v3003_v24, %s2869_s28 }
 0xd23   :  { %v1088_v35 = vpop.f32.mrb[18].mxu1 }
 0xd24   :  { %v2541_v36 = vpop.f32.mrb[19].mxu1 }
 0xd25   :  { %v2150_v36 = vld [vmem:[%s3329_s5 + $0x8] sm:$0xff] }
 0xd81   :  { %v1441_v37 = vpop.xlane.xlu1 %1440 }
 0xd82   :  { %2829 = vrcp.f32 %v1441_v37 }
 0xd85   :  { %v2799_v38 = vpop.permute.xlu1 %2798 }
 0xd86   :  { %v2801_v40 = vunpack.i.h.bf16 %v2799_v38  ;;  %v2800_v41 = vunpack.i.l.bf16 %v2799_v38 }
 0xd88   :  { %v3197_v42 = vpack.c.bf16 %v2801_v40, %v2800_v41  ;;  %v2152_v40 = vld [vmem:[%s3329_s5 + $0x18] sm:$0xff] }
 0xd89   :  { %v2754_v41 = vpack.c.bf16 %v2152_v40, %v2151_v3 }
 0xd8a   :  { %2711 = vmatpush3.bf16.xpose.msk.msra.mxu1 %vm3066_vm4, %v3197_v42 }
 0xd8b   :  { %2712 = vmatprep.subr.bf16.mxu1 %v2871_v58 }
 0xd8c   :  { %v2830_v47 = vpop.eup %2829 }
 0xd8d   :  { %v1443_v49 = vmul.f32 %v2830_v47, %v2828_v33 }
 0xd92   :  { %2715 = vmatpush3.bf16.xpose.msk.msra.mxu1 %vm3066_vm4, %v3203_v54 }
 0xd93   :  { %2568 = vmatprep.subr.mxu1 %v2863_v21 }
 0xd99   :  { %2551 = vmatmul.mubr.msk.f32.vlgmr.msra.gmra.mrb[20].mxu1 %vm171_vm3, %v1088_v35 }
 0xd9a   :  { %2569 = vmatpush3.msra.mxu1 %v1445_v48  ;;  %2570 = vmatprep.mubr.msk.f32.mxu1 %vm2864_vm2, %v2863_v21 }
 0xd9b   :  { %2724 = vmatprep.subr.bf16.mxu1 %v2871_v58 }
 0xd9d   :  { %2571 = vmatmul.mubr.msk.f32.vlgmr.msra.gmra.mrb[22].mxu1 %vm171_vm3, %v1443_v49 }
 0xd9e   :  { %2592 = vmatprep.mubr.msk.f32.mxu1 %vm2864_vm2, %v2863_v21 }
 0xda1   :  { %2727 = vmatpush3.bf16.xpose.msk.msra.mxu1 %vm3066_vm4, %v3083_v10 }
 0xda2   :  { %2728 = vmatprep.subr.bf16.mxu1 %v2871_v58 }
 0xda9   :  { %2731 = vmatpush3.bf16.xpose.msk.msra.mxu1 %vm3066_vm4, %v3092_v13  ;;  %v1669_v13 = vpop.permute.xlu1 %1668 }
 0xdaa   :  { %2600 = vmatprep.subr.mxu1 %v2863_v21 }
 0xdb0   :  { %2593 = vmatmul.mubr.msk.f32.vlgmr.msra.gmra.mrb[24].mxu1 %vm171_vm3, %v1351_v26 }
 0xdb1   :  { %2602 = vmatprep.mubr.msk.f32.mxu1 %vm2864_vm2, %v2863_v21 }
 0xe6c   :  { %v1177_v51 = vpop.f32.mrb[20].mxu1 }
 0xe6d   :  { %v1181_v10 = vadd.f32 %v1177_v51, %v3150_v53  ;;  %v2552_v52 = vpop.f32.mrb[21].mxu1  ;;  %v1667_v53 = vpop.permute.xlu0 %1666 }
 0xe6f   :  { %v1188_v55 = vadd.f32 %v3230_v50, %v1181_v10 }
 0xe70   :  { %v1516_v56 = vpop.f32.mrb[22].mxu1 }
 0xe71   :  { %v1189_v59 = vadd.f32 %v1188_v55, %v2940_v7  ;;  %v2572_v60 = vpop.f32.mrb[23].mxu1  ;;  %2582 = vmatmul.mubr.msk.f32.vlgmr.msra.gmra.mrb[10].mxu0 %vm171_vm3, %v1516_v56 }
 0xe72   :  { %2596 = vmatpush3.xpose.msk.msra.mxu0 %vm171_vm3, %v1669_v13  ;;  %2597 = vmatprep.mubr.msk.f32.mxu0 %vm2864_vm2, %v2863_v21 }
 0xe73   :  { %1190 = vst.msk [vmem:[#allocation2] sm:$0xff] %vm45_vm0, %v1189_v59  ;;  %2732 = vmatprep.subr.bf16.mxu0 %v2871_v58 }
 0xe75   :  { %2598 = vmatmul.mubr.msk.f32.vlgmr.msra.gmra.mrb[12].mxu0 %vm171_vm3, %v1667_v53 }
 0xe76   :  { %2735 = vmatpush3.bf16.xpose.msk.msra.mxu0 %vm3066_vm4, %v3121_v39  ;;  %2613 = vmatprep.mubr.msk.f32.mxu0 %vm2864_vm2, %v2863_v21 }
 0xe77   :  { %2736 = vmatprep.subr.bf16.mxu0 %v2871_v58 }
 0xe7a   :  { %v2147_v48 = vld [vmem:[#allocation2] sm:$0xff] }
 0xe7e   :  { %2739 = vmatpush3.bf16.xpose.msk.msra.mxu0 %vm3066_vm4, %v3127_v45 }
 0xe83   :  { %v1662_v7 = vpop.f32.mrb[24].mxu1 }
 0xe84   :  { %v2594_v61 = vpop.f32.mrb[25].mxu1 }
 0xf44   :  { %v1589_v62 = vpop.f32.mrb[10].mxu0 }
 0xf45   :  { %v1663_v63 = vadd.f32 %v1662_v7, %v1589_v62  ;;  %v2583_v0 = vpop.f32.mrb[11].mxu0 }
 0xf48   :  { %v1740_v2 = vpop.f32.mrb[12].mxu0 }
 0xf49   :  { %v2599_v5 = vpop.f32.mrb[13].mxu0  ;;  %v1744_v6 = vsel %vm171_vm3, %v1740_v2, -inf }
 0xf4a   :  { %1745 = vmax.xlane.f32.xlu1 %v1744_v6 }
 0xf5b   :  { %1907 = vrot.lane.b32.xlu1 %v3003_v24, %s2874_s15 }
 0xf5f   :  { %1905 = vrot.lane.b32.xlu1 %v3003_v24, %s2875_s16 }
 0xfd7   :  { %v1746_v39 = vpop.xlane.xlu1 %1745 }
 0xfd8   :  { %v1747_v8 = vsub.f32 %v1740_v2, %v1746_v39 }
 0xfda   :  { %v1748_v11 = vmul.f32 1.442695, %v1747_v8 }
 0xfdb   :  { %v1908_v17 = vpop.permute.xlu1 %1907 }
 0xfdc   :  { %2831 = vpow2.f32 %v1748_v11 }
 0xfdf   :  { %v1906_v19 = vpop.permute.xlu1 %1905 }
 0xfe6   :  { %v2832_v45 = vpop.eup %2831 }
 0xfe7   :  { %v1750_v12 = vsel %vm171_vm3, %v2832_v45, 0.0 }
 0xfe8   :  { %1751 = vadd.xlane.f32.xlu0 %v1750_v12 }
 0xffe   :  { %1755 = vrot.lane.b32.xlu0 %v3003_v24, %s2873_s3 }
0x1075   :  { %v1752_v14 = vpop.xlane.xlu0 %1751 }
0x1076   :  { %2833 = vrcp.f32 %v1752_v14 }
0x1079   :  { %v1756_v15 = vpop.permute.xlu0 %1755 }
0x107a   :  { %2601 = vmatpush3.msra.mxu1 %v1756_v15 }
0x107b   :  { %2616 = vmatprep.subr.mxu1 %v2863_v21 }
0x1080   :  { %v2834_v16 = vpop.eup %2833 }
0x1081   :  { %v1754_v18 = vmul.f32 %v2834_v16, %v2832_v45 }
0x1083   :  { %2603 = vmatmul.mubr.msk.f32.vlgmr.msra.gmra.mrb[26].mxu1 %vm171_vm3, %v1754_v18 }
0x1084   :  { %2617 = vmatpush3.xpose.msk.msra.mxu1 %vm171_vm3, %v1908_v17  ;;  %2618 = vmatprep.mubr.msk.f32.mxu1 %vm2864_vm2, %v2863_v21 }
0x1085   :  { %2621 = vmatprep.subr.mxu1 %v2863_v21 }
0x1087   :  { %2619 = vmatmul.mubr.msk.f32.vlgmr.msra.gmra.mrb[28].mxu1 %vm171_vm3, %v1906_v19 }
0x1088   :  { %2623 = vmatprep.mubr.msk.f32.mxu1 %vm2864_vm2, %v2863_v21 }
0x1156   :  { %v1827_v22 = vpop.f32.mrb[26].mxu1 }
0x1157   :  { %v2604_v1 = vpop.f32.mrb[27].mxu1  ;;  %2614 = vmatmul.mubr.msk.f32.vlgmr.msra.gmra.mrb[14].mxu0 %vm171_vm3, %v1827_v22 }
0x1158   :  { %2634 = vmatprep.mubr.msk.f32.mxu0 %vm2864_vm2, %v2863_v21 }
0x115a   :  { %v1979_v9 = vpop.f32.mrb[28].mxu1 }
0x115b   :  { %v2620_v23 = vpop.f32.mrb[29].mxu1  ;;  %v1983_v25 = vsel %vm171_vm3, %v1979_v9, -inf }
0x115c   :  { %1984 = vmax.xlane.f32.xlu0 %v1983_v25 }
0x1172   :  { %1994 = vrot.lane.b32.xlu0 %v3003_v24, %s2876_s17  ;;  %v2149_v24 = vld [vmem:[%s3329_s5] sm:$0xff]  ;;  %s2877_s5 = smov [#allocation3]  }
0x1173   :  { %v2748_v37 = vpack.c.bf16 %v2150_v36, %v2149_v24  ;;  %s2253_s0 = sshll.u32 %s2877_s5, 4  ;;  %s2254_s0 = int_to_ptr.vmem [resolvable:$true] %s2253_s0 }
0x1174   :  { %s2839_s26 = scalar_lea.vmem %s2254_s0, 256  ;;  %p2844_p1 = scmp.lt.s32.totalorder %s2254_s0, %s2254_s0 }
0x1175   :  { %2750 = vmatprep.subr.msk.bf16.mxu0 %vm2926_vm1, %v2748_v37  ;;  %p2840_p0 = scmp.ne.s32.totalorder %s2254_s0, %s2839_s26  ;;  %p2845_p2 = scmp.lt.s32.totalorder %s2839_s26, %s2839_s26 }
0x1176   :  { %2753 = vmatpush3.bf16.xpose.msk.msra.mxu0 %vm2926_vm1, %v2748_v37 }
0x1177   :  { %2756 = vmatprep.subr.msk.bf16.mxu0 %vm2926_vm1, %v2754_v41  ;;  %p2846_p3 = por %p2845_p2, %p2844_p1 }
0x1179   :  { %p2847_p4 = pnand %p2846_p3, %p2840_p0 }
0x117e   :  { %2759 = vmatpush3.bf16.xpose.msk.msra.mxu0 %vm2926_vm1, %v2754_v41 }
0x11e9   :  { %v1985_v26 = vpop.xlane.xlu0 %1984 }
0x11ea   :  { %v1986_v27 = vsub.f32 %v1979_v9, %v1985_v26 }
0x11ec   :  { %v1987_v57 = vmul.f32 1.442695, %v1986_v27 }
0x11ed   :  { %v1995_v28 = vpop.permute.xlu0 %1994 }
0x11ee   :  { %2835 = vpow2.f32 %v1987_v57  ;;  %2622 = vmatpush3.msra.mxu1 %v1995_v28 }
0x11ef   :  { %2740 = vmatprep.subr.bf16.mxu1 %v2871_v58 }
0x11f8   :  { %v2836_v29 = vpop.eup %2835 }
0x11f9   :  { %v1989_v30 = vsel %vm171_vm3, %v2836_v29, 0.0 }
0x11fa   :  { %1990 = vadd.xlane.f32.xlu1 %v1989_v30 }
0x122a   :  { %v1900_v21 = vpop.f32.mrb[14].mxu0 }
0x122b   :  { %v1904_v31 = vadd.f32 %v1900_v21, %v1663_v63  ;;  %v2615_v32 = vpop.f32.mrb[15].mxu0 }
0x1287   :  { %v1991_v33 = vpop.xlane.xlu1 %1990 }
0x1288   :  { %2837 = vrcp.f32 %v1991_v33 }
0x1292   :  { %v2838_v34 = vpop.eup %2837 }
0x1293   :  { %v1993_v35 = vmul.f32 %v2838_v34, %v2836_v29 }
0x1295   :  { %2624 = vmatmul.mubr.msk.f32.vlgmr.msra.gmra.mrb[30].mxu1 %vm171_vm3, %v1993_v35 }
0x1296   :  { %2743 = vmatpush3.bf16.xpose.msk.msra.mxu1 %vm3066_vm4, %v3197_v42 }
0x1297   :  { %2744 = vmatprep.subr.bf16.mxu1 %v2871_v58 }
0x129e   :  { %2747 = vmatpush3.bf16.xpose.msk.msra.mxu1 %vm3066_vm4, %v3203_v54 }
0x1368   :  { %v2066_v58 = vpop.f32.mrb[30].mxu1 }
0x1369   :  { %v2625_v38 = vpop.f32.mrb[31].mxu1  ;;  %2635 = vmatmul.mubr.msk.f32.vlgmr.msra.gmra.mrb[32].mxu1 %vm171_vm3, %v2066_v58 }
0x143c   :  { %v2139_v42 = vpop.f32.mrb[32].mxu1 }
0x143d   :  { %v2143_v43 = vadd.f32 %v2139_v42, %v1904_v31  ;;  %v2636_v44 = vpop.f32.mrb[33].mxu1 }
0x143f   :  { %v2144_v46 = vadd.f32 %v3230_v50, %v2143_v43 }
0x1441   :  { %v2145_v54 = vadd.f32 %v2144_v46, %v2991_v20 }
0x1443   :  { %2146 = vst.msk [vmem:[#allocation2 + $0x8] sm:$0xff] %vm45_vm0, %v2145_v54 }
0x144a   :  { %v2148_v47 = vld [vmem:[#allocation2 + $0x8] sm:$0xff] }
0x144b   :  { %2646 = vmatmul.mubr.msk.f32.vlgmr.msra.gmra.mrb[16].mxu0 %vm45_vm0, %v2148_v47 }
0x144c   :  { %2645 = vmatprep.mubr.msk.f32.mxu0 %vm45_vm0, %v2147_v48 }
0x151e   :  { %v2647_v49 = vpop.f32.mrb[16].mxu0 }
0x151f   :  { %v2243_v4 = vadd.f32 %v2647_v49, %v2148_v47  ;;  %v2237_v51 = vpop.f32.mrb[17].mxu0 }
0x1520   :  { %v2238_v10 = vadd.f32 %v2237_v51, %v2147_v48 }
0x1521   :  { %2247 = vst.msk [vmem:[#allocation3 + $0x8] sm:$0xff] %vm45_vm0, %v2243_v4 }
0x1522   :  { %2246 = vst.msk [vmem:[#allocation3] sm:$0xff] %vm45_vm0, %v2238_v10 }
0x1523   :  { %2850 = shalt.err (!%p2847_p4)
}
0x1524   :  { %s2851_s28 = scalar_lea.hbm %s3330_s6, 256 }
0x1525   :  { %p2852_p5 = scmp.ne.s32.totalorder %s3330_s6, %s2851_s28  ;;  %p2855_p6 = scmp.lt.u32.totalorder %s2851_s28, %s3330_s6 }
0x1527   :  { %p2857_p7 = pnand %p2855_p6, %p2852_p5 }
0x1529   :  { %2860 = shalt.err (!%p2857_p7)
}
0x152a   :  { %s2878_s9 = smov 128   ;;  %s2879_s10 = smov 8  }
0x152b   :  { %2259 = dma.vmem_to_hbm [thread:$0]  %s2254_s0, 256, %s3330_s6, [#allocation4], %s2878_s9, %s2878_s9, %s2879_s10  }
0x152c   :  { %2861 = dma.done.wait [#allocation4], 256  }
0x152d   :  { %2862 = vsyncadd [#allocation4], 4294967040 }
0x152e   :  { %2263 = vsyncpa [#allocation4], 1 }

// kernel: tpu_custom_call.1
= control target key start
LH: loop header
LB: loop body
LE: loop exit
PB: predicated region body
PF: predicated region fallthrough
CT: control target
= control target key end

     0   :  { %vm45_vm0 = vcmask 261120   ;;  %s3324_s0 = inlined_call_operand.vmem [shape: f32[16,32], index: 0, kind: input, shape index: {}]   ;;  %s3325_s1 = inlined_call_operand.vmem [shape: f32[96,32], index: 1, kind: input, shape index: {}]   ;;  %s3326_s2 = inlined_call_operand.vmem [shape: f32[1,96], index: 2, kind: input, shape index: {}]   ;;  %s3327_s3 = inlined_call_operand.vmem [shape: f32[32,32], index: 3, kind: input, shape index: {}]   ;;  %s3328_s4 = inlined_call_operand.vmem [shape: f32[1,32], index: 4, kind: input, shape index: {}]   ;;  %s3329_s5 = inlined_call_operand.vmem [shape: f32[32,32], index: 5, kind: input, shape index: {}]   ;;  %s3330_s6 = inlined_call_operand.hbm [shape: f32[16,32], index: 6, kind: output, shape index: {}]  }
   0x1   :  { %v26_v0 = vld [vmem:[%s3325_s1] sm:$0xff]  ;;  %v27_v1 = vld [vmem:[%s3325_s1 + $0x8] sm:$0xff]  ;;  %v28_v2 = vld [vmem:[%s3325_s1 + $0x10] sm:$0xff] }
   0x2   :  { %v2648_v3 = vpack.c.bf16 %v27_v1, %v26_v0  ;;  %vm2926_vm1 = vmpackc.low %vm45_vm0, %vm45_vm0  ;;  %v29_v5 = vld [vmem:[%s3325_s1 + $0x18] sm:$0xff]  ;;  %v2940_v7 = vld [vmem:[%s3324_s0] sm:$0xff] }
   0x3   :  { %v2654_v6 = vpack.c.bf16 %v29_v5, %v28_v2  ;;  %2466 = vmatprep.mubr.msk.f32.mxu0 %vm45_vm0, %v2940_v7 }
   0x4   :  { %2650 = vmatprep.subr.msk.bf16.mxu0 %vm2926_vm1, %v2648_v3 }
   0x5   :  { %2653 = vmatpush3.bf16.xpose.msk.msra.mxu0 %vm2926_vm1, %v2648_v3 }
   0x6   :  { %2656 = vmatprep.subr.msk.bf16.mxu0 %vm2926_vm1, %v2654_v6 }
   0x7   :  { %11 = vsyncpa [#allocation4], 0  ;;  %v30_v8 = vld [vmem:[%s3325_s1 + $0x20] sm:$0xff]  ;;  %v31_v9 = vld [vmem:[%s3325_s1 + $0x28] sm:$0xff]  ;;  %v2863_v21 = vmov 0.0   ;;  %vm2864_vm2 = vmmov 0  }
   0x8   :  { %v2660_v10 = vpack.c.bf16 %v31_v9, %v30_v8  ;;  %v32_v11 = vld [vmem:[%s3325_s1 + $0x30] sm:$0xff]  ;;  %v33_v12 = vld [vmem:[%s3325_s1 + $0x38] sm:$0xff]  ;;  %v34_v14 = vld [vmem:[%s3325_s1 + $0x40] sm:$0xff]  ;;  %2469 = vmatprep.subr.mxu1 %v2863_v21  ;;  %2471 = vmatprep.mubr.msk.f32.mxu1 %vm2864_vm2, %v2863_v21  ;;  %s2866_s26 = smov 96   ;;  %s2867_s27 = smov 88   ;;  %vm171_vm3 = vcmask 64512  }
   0x9   :  { %v2666_v13 = vpack.c.bf16 %v33_v12, %v32_v11  ;;  %v35_v15 = vld [vmem:[%s3325_s1 + $0x48] sm:$0xff]  ;;  %v36_v17 = vld [vmem:[%s3325_s1 + $0x50] sm:$0xff]  ;;  %v37_v18 = vld [vmem:[%s3325_s1 + $0x58] sm:$0xff]  ;;  %s2869_s28 = smov 80   ;;  %s2870_s9 = smov 56   ;;  %v2871_v58 = vmov 0.0|0.0  }
   0xa   :  { %v2672_v16 = vpack.c.bf16 %v35_v15, %v34_v14  ;;  %v2678_v19 = vpack.c.bf16 %v37_v18, %v36_v17  ;;  %v2991_v20 = vld [vmem:[%s3324_s0 + $0x8] sm:$0xff]  ;;  %v2264_v22 = vld [vmem:[%s3326_s2] ss:$0 sm:$0xff]  ;;  %s2865_s0 = smov 64   ;;  %s2868_s2 = smov 120   ;;  %v165_v55 = vld [vmem:[%s3327_s3 + $0x10] sm:$0xff] }
   0xb   :  { %v163_v52 = vld [vmem:[%s3327_s3] sm:$0xff]  ;;  %v164_v53 = vld [vmem:[%s3327_s3 + $0x8] sm:$0xff]  ;;  %v166_v56 = vld [vmem:[%s3327_s3 + $0x18] sm:$0xff]  ;;  %s2872_s14 = smov 112   ;;  %s2873_s3 = smov 48  }
   0xc   :  { %v3044_v54 = vpack.i.bf16 %v164_v53, %v163_v52  ;;  %v3054_v57 = vpack.i.bf16 %v166_v56, %v165_v55  ;;  %vm3066_vm4 = vmpackc.low %vm171_vm3, %vm171_vm3  ;;  %s2874_s15 = smov 72   ;;  %s2875_s16 = smov 104   ;;  %v2151_v3 = vld [vmem:[%s3329_s5 + $0x10] sm:$0xff] }
   0xd   :  { %2659 = vmatpush3.bf16.xpose.msk.msra.mxu0 %vm2926_vm1, %v2654_v6  ;;  %s2876_s17 = smov 40  }
   0xe   :  { %2662 = vmatprep.subr.msk.bf16.mxu0 %vm2926_vm1, %v2660_v10 }
  0x15   :  { %2665 = vmatpush3.bf16.xpose.msk.msra.mxu0 %vm2926_vm1, %v2660_v10  ;;  %v3083_v10 = vpack.c.bf16 %v164_v53, %v163_v52 }
  0x16   :  { %2668 = vmatprep.subr.msk.bf16.mxu0 %vm2926_vm1, %v2666_v13 }
  0x1d   :  { %2671 = vmatpush3.bf16.xpose.msk.msra.mxu0 %vm2926_vm1, %v2666_v13  ;;  %v3092_v13 = vpack.c.bf16 %v166_v56, %v165_v55 }
  0x1e   :  { %2674 = vmatprep.subr.msk.bf16.mxu0 %vm2926_vm1, %v2672_v16 }
  0x25   :  { %2677 = vmatpush3.bf16.xpose.msk.msra.mxu0 %vm2926_vm1, %v2672_v16 }
  0x26   :  { %2680 = vmatprep.subr.msk.bf16.mxu0 %vm2926_vm1, %v2678_v19 }
  0x2d   :  { %2683 = vmatpush3.bf16.xpose.msk.msra.mxu0 %vm2926_vm1, %v2678_v19 }
  0x2e   :  { %2700 = vmatprep.subr.bf16.mxu0 %v2871_v58 }
  0x34   :  { %2467 = vmatmul.mubr.msk.f32.vlgmr.msra.gmra.mrb[0].mxu0 %vm45_vm0, %v2991_v20 }
  0x35   :  { %2529 = vmatprep.mubr.msk.f32.mxu0 %vm2864_vm2, %v2863_v21 }
 0x107   :  { %v2468_v23 = vpop.f32.mrb[0].mxu0 }
 0x108   :  { %v3003_v24 = vadd.f32 %v2468_v23, %v2264_v22  ;;  %v154_v25 = vpop.f32.mrb[1].mxu0 }
 0x109   :  { %v3005_v26 = vadd.f32 %v2264_v22, %v154_v25 }
 0x10b   :  { %257 = vrot.lane.b32.xlu1 %v3005_v26, %s2865_s0  ;;  %169 = vrot.lane.b32.xlu0 %v3005_v26, %s2866_s26 }
 0x10f   :  { %335 = vrot.lane.b32.xlu1 %v3005_v26, %s2867_s27 }
 0x17d   :  { %v170_v27 = vpop.permute.xlu0 %169  ;;  %v258_v28 = vpop.permute.xlu1 %257 }
 0x17e   :  { %2470 = vmatpush3.xpose.msk.msra.mxu1 %vm171_vm3, %v170_v27 }
 0x17f   :  { %2474 = vmatprep.subr.mxu1 %v2863_v21 }
 0x181   :  { %2472 = vmatmul.mubr.msk.f32.vlgmr.msra.gmra.mrb[0].mxu1 %vm171_vm3, %v3005_v26  ;;  %v336_v37 = vpop.permute.xlu1 %335 }
 0x182   :  { %2475 = vmatpush3.msra.mxu1 %v258_v28  ;;  %2476 = vmatprep.mubr.msk.f32.mxu1 %vm2864_vm2, %v2863_v21 }
 0x183   :  { %2479 = vmatprep.subr.mxu1 %v2863_v21 }
 0x254   :  { %v242_v29 = vpop.f32.mrb[0].mxu1 }
 0x255   :  { %v2473_v30 = vpop.f32.mrb[1].mxu1  ;;  %v246_v31 = vsel %vm171_vm3, %v242_v29, -inf }
 0x256   :  { %247 = vmax.xlane.f32.xlu0 %v246_v31 }
 0x2e3   :  { %v248_v32 = vpop.xlane.xlu0 %247 }
 0x2e4   :  { %v249_v33 = vsub.f32 %v242_v29, %v248_v32 }
 0x2e6   :  { %v250_v34 = vmul.f32 1.442695, %v249_v33 }
 0x2e8   :  { %2807 = vpow2.f32 %v250_v34 }
 0x2f2   :  { %v2808_v35 = vpop.eup %2807 }
 0x2f3   :  { %v252_v36 = vsel %vm171_vm3, %v2808_v35, 0.0 }
 0x2f4   :  { %253 = vadd.xlane.f32.xlu1 %v252_v36 }
 0x305   :  { %333 = vrot.lane.b32.xlu1 %v3005_v26, %s2868_s2 }
 0x381   :  { %v254_v38 = vpop.xlane.xlu1 %253 }
 0x382   :  { %2809 = vrcp.f32 %v254_v38 }
 0x385   :  { %v334_v41 = vpop.permute.xlu1 %333 }
 0x38c   :  { %v2810_v39 = vpop.eup %2809 }
 0x38d   :  { %v256_v40 = vmul.f32 %v2810_v39, %v2808_v35 }
 0x38f   :  { %2477 = vmatmul.mubr.msk.f32.vlgmr.msra.gmra.mrb[2].mxu1 %vm171_vm3, %v256_v40 }
 0x390   :  { %2480 = vmatpush3.xpose.msk.msra.mxu1 %vm171_vm3, %v336_v37  ;;  %2481 = vmatprep.mubr.msk.f32.mxu1 %vm2864_vm2, %v2863_v21 }
 0x391   :  { %2484 = vmatprep.subr.mxu1 %v2863_v21 }
 0x393   :  { %2482 = vmatmul.mubr.msk.f32.vlgmr.msra.gmra.mrb[4].mxu1 %vm171_vm3, %v334_v41 }
 0x394   :  { %2486 = vmatprep.mubr.msk.f32.mxu1 %vm2864_vm2, %v2863_v21 }
 0x462   :  { %v329_v42 = vpop.f32.mrb[2].mxu1 }
 0x463   :  { %v2478_v43 = vpop.f32.mrb[3].mxu1 }
 0x466   :  { %v407_v44 = vpop.f32.mrb[4].mxu1 }
 0x467   :  { %v2483_v45 = vpop.f32.mrb[5].mxu1  ;;  %v411_v46 = vsel %vm171_vm3, %v407_v44, -inf }
 0x468   :  { %412 = vmax.xlane.f32.xlu1 %v411_v46 }
 0x479   :  { %674 = vrot.lane.b32.xlu1 %v3005_v26, %s2869_s28 }
 0x4f5   :  { %v413_v47 = vpop.xlane.xlu1 %412 }
 0x4f6   :  { %v414_v48 = vsub.f32 %v407_v44, %v413_v47 }
 0x4f8   :  { %v415_v49 = vmul.f32 1.442695, %v414_v48 }
 0x4f9   :  { %v675_v14 = vpop.permute.xlu1 %674 }
 0x4fa   :  { %2811 = vpow2.f32 %v415_v49 }
 0x504   :  { %v2812_v50 = vpop.eup %2811 }
 0x505   :  { %v417_v51 = vsel %vm171_vm3, %v2812_v50, 0.0 }
 0x506   :  { %418 = vadd.xlane.f32.xlu0 %v417_v51 }
 0x51c   :  { %422 = vrot.lane.b32.xlu0 %v3005_v26, %s2870_s9 }
 0x520   :  { %2778 = vrot.lane.b32.xlu0 %v3044_v54, %s2868_s2 }
 0x524   :  { %2783 = vrot.lane.b32.xlu0 %v3054_v57, %s2868_s2 }
 0x528   :  { %672 = vrot.lane.b32.xlu0 %v3005_v26, %s2872_s14 }
 0x593   :  { %v419_v59 = vpop.xlane.xlu0 %418 }
 0x594   :  { %2813 = vrcp.f32 %v419_v59 }
 0x597   :  { %v423_v60 = vpop.permute.xlu0 %422 }
 0x598   :  { %2485 = vmatpush3.msra.mxu1 %v423_v60 }
 0x599   :  { %2684 = vmatprep.subr.bf16.mxu1 %v2871_v58 }
 0x59b   :  { %v2779_v61 = vpop.permute.xlu0 %2778 }
 0x59c   :  { %v2781_v62 = vunpack.i.h.bf16 %v2779_v61  ;;  %v2780_v63 = vunpack.i.l.bf16 %v2779_v61 }
 0x59e   :  { %v2814_v0 = vpop.eup %2813  ;;  %v3062_v1 = vpack.c.bf16 %v2781_v62, %v2780_v63 }
 0x59f   :  { %v421_v2 = vmul.f32 %v2814_v0, %v2812_v50  ;;  %v2784_v5 = vpop.permute.xlu0 %2783 }
 0x5a0   :  { %v2786_v6 = vunpack.i.h.bf16 %v2784_v5  ;;  %v2785_v8 = vunpack.i.l.bf16 %v2784_v5 }
 0x5a1   :  { %2487 = vmatmul.mubr.msk.f32.vlgmr.msra.gmra.mrb[6].mxu1 %vm171_vm3, %v421_v2 }
 0x5a2   :  { %2687 = vmatpush3.bf16.xpose.msk.msra.mxu1 %vm3066_vm4, %v3062_v1  ;;  %2497 = vmatprep.mubr.msk.f32.mxu1 %vm2864_vm2, %v2863_v21  ;;  %v3077_v9 = vpack.c.bf16 %v2786_v6, %v2785_v8 }
 0x5a3   :  { %2688 = vmatprep.subr.bf16.mxu1 %v2871_v58  ;;  %v673_v15 = vpop.permute.xlu0 %672 }
 0x5aa   :  { %2691 = vmatpush3.bf16.xpose.msk.msra.mxu1 %vm3066_vm4, %v3077_v9 }
 0x5ab   :  { %2692 = vmatprep.subr.bf16.mxu1 %v2871_v58 }
 0x674   :  { %v494_v11 = vpop.f32.mrb[6].mxu1 }
 0x675   :  { %v2488_v12 = vpop.f32.mrb[7].mxu1  ;;  %2498 = vmatmul.mubr.msk.f32.vlgmr.msra.gmra.mrb[8].mxu1 %vm171_vm3, %v494_v11 }
 0x676   :  { %2695 = vmatpush3.bf16.xpose.msk.msra.mxu1 %vm3066_vm4, %v3083_v10  ;;  %2508 = vmatprep.mubr.msk.f32.mxu1 %vm2864_vm2, %v2863_v21 }
 0x677   :  { %2696 = vmatprep.subr.bf16.mxu1 %v2871_v58 }
 0x67e   :  { %2699 = vmatpush3.bf16.xpose.msk.msra.mxu1 %vm3066_vm4, %v3092_v13 }
 0x67f   :  { %2511 = vmatprep.subr.mxu1 %v2863_v21 }
 0x685   :  { %2509 = vmatmul.mubr.msk.f32.vlgmr.msra.gmra.mrb[10].mxu1 %vm171_vm3, %v329_v42 }
 0x686   :  { %2512 = vmatpush3.xpose.msk.msra.mxu1 %vm171_vm3, %v675_v14  ;;  %2513 = vmatprep.mubr.msk.f32.mxu1 %vm2864_vm2, %v2863_v21 }
 0x687   :  { %2516 = vmatprep.subr.mxu1 %v2863_v21 }
 0x689   :  { %2514 = vmatmul.mubr.msk.f32.vlgmr.msra.gmra.mrb[12].mxu1 %vm171_vm3, %v673_v15 }
 0x68a   :  { %2518 = vmatprep.mubr.msk.f32.mxu1 %vm2864_vm2, %v2863_v21 }
 0x748   :  { %v587_v16 = vpop.f32.mrb[8].mxu1 }
 0x749   :  { %v2499_v17 = vpop.f32.mrb[9].mxu1 }
 0x758   :  { %v668_v18 = vpop.f32.mrb[10].mxu1 }
 0x759   :  { %v669_v19 = vadd.f32 %v668_v18, %v587_v16  ;;  %v2510_v22 = vpop.f32.mrb[11].mxu1 }
 0x75c   :  { %v746_v23 = vpop.f32.mrb[12].mxu1 }
 0x75d   :  { %v2515_v25 = vpop.f32.mrb[13].mxu1  ;;  %v750_v27 = vsel %vm171_vm3, %v746_v23, -inf }
 0x75e   :  { %751 = vmax.xlane.f32.xlu0 %v750_v27 }
 0x774   :  { %761 = vrot.lane.b32.xlu0 %v3005_v26, %s2873_s3 }
 0x778   :  { %2793 = vrot.lane.b32.xlu0 %v3054_v57, %s2872_s14 }
 0x77c   :  { %1192 = vrot.lane.b32.xlu0 %v3003_v24, %s2866_s26 }
 0x780   :  { %929 = vrot.lane.b32.xlu0 %v3005_v26, %s2874_s15 }
 0x7eb   :  { %v752_v28 = vpop.xlane.xlu0 %751 }
 0x7ec   :  { %v753_v29 = vsub.f32 %v746_v23, %v752_v28 }
 0x7ee   :  { %v754_v30 = vmul.f32 1.442695, %v753_v29 }
 0x7ef   :  { %v762_v31 = vpop.permute.xlu0 %761 }
 0x7f0   :  { %2815 = vpow2.f32 %v754_v30  ;;  %2517 = vmatpush3.msra.mxu1 %v762_v31 }
 0x7f1   :  { %2532 = vmatprep.subr.mxu1 %v2863_v21 }
 0x7f3   :  { %v2794_v35 = vpop.permute.xlu0 %2793 }
 0x7f4   :  { %v2796_v41 = vunpack.i.h.bf16 %v2794_v35  ;;  %v2795_v42 = vunpack.i.l.bf16 %v2794_v35 }
 0x7f6   :  { %v3127_v45 = vpack.c.bf16 %v2796_v41, %v2795_v42 }
 0x7f7   :  { %v1193_v40 = vpop.permute.xlu0 %1192 }
 0x7fa   :  { %v2816_v32 = vpop.eup %2815 }
 0x7fb   :  { %v756_v33 = vsel %vm171_vm3, %v2816_v32, 0.0  ;;  %v930_v46 = vpop.permute.xlu0 %929 }
 0x7fc   :  { %757 = vadd.xlane.f32.xlu1 %v756_v33 }
 0x80d   :  { %2788 = vrot.lane.b32.xlu1 %v3044_v54, %s2872_s14 }
 0x811   :  { %927 = vrot.lane.b32.xlu1 %v3005_v26, %s2875_s16 }
 0x889   :  { %v758_v34 = vpop.xlane.xlu1 %757 }
 0x88a   :  { %2817 = vrcp.f32 %v758_v34 }
 0x88d   :  { %v2789_v36 = vpop.permute.xlu1 %2788 }
 0x88e   :  { %v2791_v37 = vunpack.i.h.bf16 %v2789_v36  ;;  %v2790_v38 = vunpack.i.l.bf16 %v2789_v36 }
 0x890   :  { %v3121_v39 = vpack.c.bf16 %v2791_v37, %v2790_v38 }
 0x891   :  { %v928_v47 = vpop.permute.xlu1 %927 }
 0x892   :  { %2703 = vmatpush3.bf16.xpose.msk.msra.mxu0 %vm3066_vm4, %v3121_v39 }
 0x893   :  { %2704 = vmatprep.subr.bf16.mxu0 %v2871_v58 }
 0x894   :  { %v2818_v43 = vpop.eup %2817 }
 0x895   :  { %v760_v44 = vmul.f32 %v2818_v43, %v2816_v32 }
 0x897   :  { %2519 = vmatmul.mubr.msk.f32.vlgmr.msra.gmra.mrb[14].mxu1 %vm171_vm3, %v760_v44 }
 0x898   :  { %2533 = vmatpush3.xpose.msk.msra.mxu1 %vm171_vm3, %v930_v46  ;;  %2534 = vmatprep.mubr.msk.f32.mxu1 %vm2864_vm2, %v2863_v21 }
 0x899   :  { %2537 = vmatprep.subr.mxu1 %v2863_v21 }
 0x89a   :  { %2707 = vmatpush3.bf16.xpose.msk.msra.mxu0 %vm3066_vm4, %v3127_v45 }
 0x89b   :  { %2535 = vmatmul.mubr.msk.f32.vlgmr.msra.gmra.mrb[16].mxu1 %vm171_vm3, %v928_v47  ;;  %2553 = vmatprep.subr.mxu0 %v2863_v21 }
 0x89c   :  { %2539 = vmatprep.mubr.msk.f32.mxu1 %vm2864_vm2, %v2863_v21 }
 0x96a   :  { %v833_v48 = vpop.f32.mrb[14].mxu1 }
 0x96b   :  { %v2520_v49 = vpop.f32.mrb[15].mxu1  ;;  %2530 = vmatmul.mubr.msk.f32.vlgmr.msra.gmra.mrb[2].mxu0 %vm171_vm3, %v833_v48 }
 0x96c   :  { %2554 = vmatpush3.xpose.msk.msra.mxu0 %vm171_vm3, %v1193_v40  ;;  %2555 = vmatprep.mubr.msk.f32.mxu0 %vm2864_vm2, %v2863_v21 }
 0x96d   :  { %2558 = vmatprep.subr.mxu0 %v2863_v21 }
 0x96e   :  { %v1001_v50 = vpop.f32.mrb[16].mxu1 }
 0x96f   :  { %v2536_v51 = vpop.f32.mrb[17].mxu1  ;;  %2556 = vmatmul.mubr.msk.f32.vlgmr.msra.gmra.mrb[4].mxu0 %vm171_vm3, %v3003_v24  ;;  %v1005_v6 = vsel %vm171_vm3, %v1001_v50, -inf }
 0x970   :  { %2560 = vmatprep.mubr.msk.f32.mxu0 %vm2864_vm2, %v2863_v21 }
 0xa3e   :  { %v922_v52 = vpop.f32.mrb[2].mxu0 }
 0xa3f   :  { %v3150_v53 = vadd.f32 %v922_v52, %v669_v19  ;;  %v2531_v55 = vpop.f32.mrb[3].mxu0 }
 0xa42   :  { %v1264_v56 = vpop.f32.mrb[4].mxu0 }
 0xa43   :  { %v2557_v59 = vpop.f32.mrb[5].mxu0  ;;  %v1268_v60 = vsel %vm171_vm3, %v1264_v56, -inf }
 0xa44   :  { %1269 = vmax.xlane.f32.xlu0 %v1268_v60 }
 0xa5a   :  { %1279 = vrot.lane.b32.xlu0 %v3003_v24, %s2865_s0 }
 0xa5e   :  { %1355 = vrot.lane.b32.xlu0 %v3003_v24, %s2868_s2 }
 0xad1   :  { %v1270_v61 = vpop.xlane.xlu0 %1269 }
 0xad2   :  { %v1271_v62 = vsub.f32 %v1264_v56, %v1270_v61 }
 0xad4   :  { %v1272_v63 = vmul.f32 1.442695, %v1271_v62 }
 0xad5   :  { %v1280_v0 = vpop.permute.xlu0 %1279 }
 0xad6   :  { %2819 = vpow2.f32 %v1272_v63  ;;  %2559 = vmatpush3.msra.mxu0 %v1280_v0 }
 0xad7   :  { %2563 = vmatprep.subr.mxu0 %v2863_v21 }
 0xad9   :  { %v1356_v15 = vpop.permute.xlu0 %1355 }
 0xae0   :  { %v2820_v2 = vpop.eup %2819 }
 0xae1   :  { %v1274_v5 = vsel %vm171_vm3, %v2820_v2, 0.0 }
 0xae2   :  { %1275 = vadd.xlane.f32.xlu1 %v1274_v5 }
 0xaf3   :  { %1357 = vrot.lane.b32.xlu1 %v3003_v24, %s2867_s27 }
 0xb17   :  { %1006 = vmax.xlane.f32.xlu1 %v1005_v6 }
 0xb6f   :  { %v1276_v8 = vpop.xlane.xlu1 %1275 }
 0xb70   :  { %2821 = vrcp.f32 %v1276_v8 }
 0xb73   :  { %v1358_v14 = vpop.permute.xlu1 %1357 }
 0xb7a   :  { %v2822_v11 = vpop.eup %2821 }
 0xb7b   :  { %v1278_v12 = vmul.f32 %v2822_v11, %v2820_v2 }
 0xb7d   :  { %2561 = vmatmul.mubr.msk.f32.vlgmr.msra.gmra.mrb[6].mxu0 %vm171_vm3, %v1278_v12 }
 0xb7e   :  { %2564 = vmatpush3.xpose.msk.msra.mxu0 %vm171_vm3, %v1358_v14  ;;  %2565 = vmatprep.mubr.msk.f32.mxu0 %vm2864_vm2, %v2863_v21 }
 0xb7f   :  { %2716 = vmatprep.subr.bf16.mxu0 %v2871_v58 }
 0xb81   :  { %2566 = vmatmul.mubr.msk.f32.vlgmr.msra.gmra.mrb[8].mxu0 %vm171_vm3, %v1356_v15 }
 0xb82   :  { %2719 = vmatpush3.bf16.xpose.msk.msra.mxu0 %vm3066_vm4, %v3062_v1  ;;  %2581 = vmatprep.mubr.msk.f32.mxu0 %vm2864_vm2, %v2863_v21 }
 0xb83   :  { %2720 = vmatprep.subr.bf16.mxu0 %v2871_v58 }
 0xb8a   :  { %2723 = vmatpush3.bf16.xpose.msk.msra.mxu0 %vm3066_vm4, %v3077_v9 }
 0xb8b   :  { %2595 = vmatprep.subr.mxu0 %v2863_v21 }
 0xba4   :  { %v1007_v16 = vpop.xlane.xlu1 %1006 }
 0xba5   :  { %v1008_v17 = vsub.f32 %v1001_v50, %v1007_v16  ;;  %v3230_v50 = vld [vmem:[%s3328_s4] ss:$0 sm:$0xff] }
 0xba7   :  { %v1009_v18 = vmul.f32 1.442695, %v1008_v17 }
 0xba9   :  { %2823 = vpow2.f32 %v1009_v18 }
 0xbb3   :  { %v2824_v19 = vpop.eup %2823 }
 0xbb4   :  { %v1011_v22 = vsel %vm171_vm3, %v2824_v19, 0.0 }
 0xbb5   :  { %1012 = vadd.xlane.f32.xlu0 %v1011_v22 }
 0xbcb   :  { %1016 = vrot.lane.b32.xlu0 %v3005_v26, %s2876_s17 }
 0xbcf   :  { %2803 = vrot.lane.b32.xlu0 %v3054_v57, %s2875_s16 }
 0xbd3   :  { %1444 = vrot.lane.b32.xlu0 %v3003_v24, %s2870_s9 }
 0xbd7   :  { %1666 = vrot.lane.b32.xlu0 %v3003_v24, %s2872_s14 }
 0xc42   :  { %v1013_v1 = vpop.xlane.xlu0 %1012 }
 0xc43   :  { %2825 = vrcp.f32 %v1013_v1 }
 0xc46   :  { %v1017_v9 = vpop.permute.xlu0 %1016 }
 0xc47   :  { %2538 = vmatpush3.msra.mxu1 %v1017_v9 }
 0xc48   :  { %2708 = vmatprep.subr.bf16.mxu1 %v2871_v58 }
 0xc4a   :  { %v2804_v43 = vpop.permute.xlu0 %2803 }
 0xc4b   :  { %v2806_v44 = vunpack.i.h.bf16 %v2804_v43  ;;  %v2805_v46 = vunpack.i.l.bf16 %v2804_v43 }
 0xc4d   :  { %v2826_v23 = vpop.eup %2825 }
 0xc4e   :  { %v1015_v25 = vmul.f32 %v2826_v23, %v2824_v19  ;;  %v1445_v48 = vpop.permute.xlu0 %1444 }
 0xc50   :  { %2540 = vmatmul.mubr.msk.f32.vlgmr.msra.gmra.mrb[18].mxu1 %vm171_vm3, %v1015_v25  ;;  %v1351_v26 = vpop.f32.mrb[6].mxu0 }
 0xc51   :  { %v2562_v27 = vpop.f32.mrb[7].mxu0  ;;  %2550 = vmatprep.mubr.msk.f32.mxu1 %vm2864_vm2, %v2863_v21 }
 0xc54   :  { %v1429_v57 = vpop.f32.mrb[8].mxu0 }
 0xc55   :  { %v2567_v28 = vpop.f32.mrb[9].mxu0  ;;  %v1433_v29 = vsel %vm171_vm3, %v1429_v57, -inf }
 0xc56   :  { %1434 = vmax.xlane.f32.xlu1 %v1433_v29 }
 0xce3   :  { %v1435_v30 = vpop.xlane.xlu1 %1434 }
 0xce4   :  { %v1436_v31 = vsub.f32 %v1429_v57, %v1435_v30 }
 0xce6   :  { %v1437_v32 = vmul.f32 1.442695, %v1436_v31 }
 0xce8   :  { %2827 = vpow2.f32 %v1437_v32 }
 0xcf2   :  { %v2828_v33 = vpop.eup %2827 }
 0xcf3   :  { %v1439_v34 = vsel %vm171_vm3, %v2828_v33, 0.0 }
 0xcf4   :  { %1440 = vadd.xlane.f32.xlu1 %v1439_v34 }
 0xd05   :  { %2798 = vrot.lane.b32.xlu1 %v3044_v54, %s2875_s16  ;;  %v3203_v54 = vpack.c.bf16 %v2806_v44, %v2805_v46 }
 0xd09   :  { %1668 = vrot.lane.b32.xlu1 %v3003_v24, %s2869_s28 }
 0xd23   :  { %v1088_v35 = vpop.f32.mrb[18].mxu1 }
 0xd24   :  { %v2541_v36 = vpop.f32.mrb[19].mxu1 }
 0xd25   :  { %v2150_v36 = vld [vmem:[%s3329_s5 + $0x8] sm:$0xff] }
 0xd81   :  { %v1441_v37 = vpop.xlane.xlu1 %1440 }
 0xd82   :  { %2829 = vrcp.f32 %v1441_v37 }
 0xd85   :  { %v2799_v38 = vpop.permute.xlu1 %2798 }
 0xd86   :  { %v2801_v40 = vunpack.i.h.bf16 %v2799_v38  ;;  %v2800_v41 = vunpack.i.l.bf16 %v2799_v38 }
 0xd88   :  { %v3197_v42 = vpack.c.bf16 %v2801_v40, %v2800_v41  ;;  %v2152_v40 = vld [vmem:[%s3329_s5 + $0x18] sm:$0xff] }
 0xd89   :  { %v2754_v41 = vpack.c.bf16 %v2152_v40, %v2151_v3 }
 0xd8a   :  { %2711 = vmatpush3.bf16.xpose.msk.msra.mxu1 %vm3066_vm4, %v3197_v42 }
 0xd8b   :  { %2712 = vmatprep.subr.bf16.mxu1 %v2871_v58 }
 0xd8c   :  { %v2830_v47 = vpop.eup %2829 }
 0xd8d   :  { %v1443_v49 = vmul.f32 %v2830_v47, %v2828_v33 }
 0xd92   :  { %2715 = vmatpush3.bf16.xpose.msk.msra.mxu1 %vm3066_vm4, %v3203_v54 }
 0xd93   :  { %2568 = vmatprep.subr.mxu1 %v2863_v21 }
 0xd99   :  { %2551 = vmatmul.mubr.msk.f32.vlgmr.msra.gmra.mrb[20].mxu1 %vm171_vm3, %v1088_v35 }
 0xd9a   :  { %2569 = vmatpush3.msra.mxu1 %v1445_v48  ;;  %2570 = vmatprep.mubr.msk.f32.mxu1 %vm2864_vm2, %v2863_v21 }
 0xd9b   :  { %2724 = vmatprep.subr.bf16.mxu1 %v2871_v58 }
 0xd9d   :  { %2571 = vmatmul.mubr.msk.f32.vlgmr.msra.gmra.mrb[22].mxu1 %vm171_vm3, %v1443_v49 }
 0xd9e   :  { %2592 = vmatprep.mubr.msk.f32.mxu1 %vm2864_vm2, %v2863_v21 }
 0xda1   :  { %2727 = vmatpush3.bf16.xpose.msk.msra.mxu1 %vm3066_vm4, %v3083_v10 }
 0xda2   :  { %2728 = vmatprep.subr.bf16.mxu1 %v2871_v58 }
 0xda9   :  { %2731 = vmatpush3.bf16.xpose.msk.msra.mxu1 %vm3066_vm4, %v3092_v13  ;;  %v1669_v13 = vpop.permute.xlu1 %1668 }
 0xdaa   :  { %2600 = vmatprep.subr.mxu1 %v2863_v21 }
 0xdb0   :  { %2593 = vmatmul.mubr.msk.f32.vlgmr.msra.gmra.mrb[24].mxu1 %vm171_vm3, %v1351_v26 }
 0xdb1   :  { %2602 = vmatprep.mubr.msk.f32.mxu1 %vm2864_vm2, %v2863_v21 }
 0xe6c   :  { %v1177_v51 = vpop.f32.mrb[20].mxu1 }
 0xe6d   :  { %v1181_v10 = vadd.f32 %v1177_v51, %v3150_v53  ;;  %v2552_v52 = vpop.f32.mrb[21].mxu1  ;;  %v1667_v53 = vpop.permute.xlu0 %1666 }
 0xe6f   :  { %v1188_v55 = vadd.f32 %v3230_v50, %v1181_v10 }
 0xe70   :  { %v1516_v56 = vpop.f32.mrb[22].mxu1 }
 0xe71   :  { %v1189_v59 = vadd.f32 %v1188_v55, %v2940_v7  ;;  %v2572_v60 = vpop.f32.mrb[23].mxu1  ;;  %2582 = vmatmul.mubr.msk.f32.vlgmr.msra.gmra.mrb[10].mxu0 %vm171_vm3, %v1516_v56 }
 0xe72   :  { %2596 = vmatpush3.xpose.msk.msra.mxu0 %vm171_vm3, %v1669_v13  ;;  %2597 = vmatprep.mubr.msk.f32.mxu0 %vm2864_vm2, %v2863_v21 }
 0xe73   :  { %1190 = vst.msk [vmem:[#allocation2] sm:$0xff] %vm45_vm0, %v1189_v59  ;;  %2732 = vmatprep.subr.bf16.mxu0 %v2871_v58 }
 0xe75   :  { %2598 = vmatmul.mubr.msk.f32.vlgmr.msra.gmra.mrb[12].mxu0 %vm171_vm3, %v1667_v53 }
 0xe76   :  { %2735 = vmatpush3.bf16.xpose.msk.msra.mxu0 %vm3066_vm4, %v3121_v39  ;;  %2613 = vmatprep.mubr.msk.f32.mxu0 %vm2864_vm2, %v2863_v21 }
 0xe77   :  { %2736 = vmatprep.subr.bf16.mxu0 %v2871_v58 }
 0xe7a   :  { %v2147_v48 = vld [vmem:[#allocation2] sm:$0xff] }
 0xe7e   :  { %2739 = vmatpush3.bf16.xpose.msk.msra.mxu0 %vm3066_vm4, %v3127_v45 }
 0xe83   :  { %v1662_v7 = vpop.f32.mrb[24].mxu1 }
 0xe84   :  { %v2594_v61 = vpop.f32.mrb[25].mxu1 }
 0xf44   :  { %v1589_v62 = vpop.f32.mrb[10].mxu0 }
 0xf45   :  { %v1663_v63 = vadd.f32 %v1662_v7, %v1589_v62  ;;  %v2583_v0 = vpop.f32.mrb[11].mxu0 }
 0xf48   :  { %v1740_v2 = vpop.f32.mrb[12].mxu0 }
 0xf49   :  { %v2599_v5 = vpop.f32.mrb[13].mxu0  ;;  %v1744_v6 = vsel %vm171_vm3, %v1740_v2, -inf }
 0xf4a   :  { %1745 = vmax.xlane.f32.xlu1 %v1744_v6 }
 0xf5b   :  { %1907 = vrot.lane.b32.xlu1 %v3003_v24, %s2874_s15 }
 0xf5f   :  { %1905 = vrot.lane.b32.xlu1 %v3003_v24, %s2875_s16 }
 0xfd7   :  { %v1746_v39 = vpop.xlane.xlu1 %1745 }
 0xfd8   :  { %v1747_v8 = vsub.f32 %v1740_v2, %v1746_v39 }
 0xfda   :  { %v1748_v11 = vmul.f32 1.442695, %v1747_v8 }
 0xfdb   :  { %v1908_v17 = vpop.permute.xlu1 %1907 }
 0xfdc   :  { %2831 = vpow2.f32 %v1748_v11 }
 0xfdf   :  { %v1906_v19 = vpop.permute.xlu1 %1905 }
 0xfe6   :  { %v2832_v45 = vpop.eup %2831 }
 0xfe7   :  { %v1750_v12 = vsel %vm171_vm3, %v2832_v45, 0.0 }
 0xfe8   :  { %1751 = vadd.xlane.f32.xlu0 %v1750_v12 }
 0xffe   :  { %1755 = vrot.lane.b32.xlu0 %v3003_v24, %s2873_s3 }
0x1075   :  { %v1752_v14 = vpop.xlane.xlu0 %1751 }
0x1076   :  { %2833 = vrcp.f32 %v1752_v14 }
0x1079   :  { %v1756_v15 = vpop.permute.xlu0 %1755 }
0x107a   :  { %2601 = vmatpush3.msra.mxu1 %v1756_v15 }
0x107b   :  { %2616 = vmatprep.subr.mxu1 %v2863_v21 }
0x1080   :  { %v2834_v16 = vpop.eup %2833 }
0x1081   :  { %v1754_v18 = vmul.f32 %v2834_v16, %v2832_v45 }
0x1083   :  { %2603 = vmatmul.mubr.msk.f32.vlgmr.msra.gmra.mrb[26].mxu1 %vm171_vm3, %v1754_v18 }
0x1084   :  { %2617 = vmatpush3.xpose.msk.msra.mxu1 %vm171_vm3, %v1908_v17  ;;  %2618 = vmatprep.mubr.msk.f32.mxu1 %vm2864_vm2, %v2863_v21 }
0x1085   :  { %2621 = vmatprep.subr.mxu1 %v2863_v21 }
0x1087   :  { %2619 = vmatmul.mubr.msk.f32.vlgmr.msra.gmra.mrb[28].mxu1 %vm171_vm3, %v1906_v19 }
0x1088   :  { %2623 = vmatprep.mubr.msk.f32.mxu1 %vm2864_vm2, %v2863_v21 }
0x1156   :  { %v1827_v22 = vpop.f32.mrb[26].mxu1 }
0x1157   :  { %v2604_v1 = vpop.f32.mrb[27].mxu1  ;;  %2614 = vmatmul.mubr.msk.f32.vlgmr.msra.gmra.mrb[14].mxu0 %vm171_vm3, %v1827_v22 }
0x1158   :  { %2634 = vmatprep.mubr.msk.f32.mxu0 %vm2864_vm2, %v2863_v21 }
0x115a   :  { %v1979_v9 = vpop.f32.mrb[28].mxu1 }
0x115b   :  { %v2620_v23 = vpop.f32.mrb[29].mxu1  ;;  %v1983_v25 = vsel %vm171_vm3, %v1979_v9, -inf }
0x115c   :  { %1984 = vmax.xlane.f32.xlu0 %v1983_v25 }
0x1172   :  { %1994 = vrot.lane.b32.xlu0 %v3003_v24, %s2876_s17  ;;  %v2149_v24 = vld [vmem:[%s3329_s5] sm:$0xff]  ;;  %s2877_s5 = smov [#allocation3]  }
0x1173   :  { %v2748_v37 = vpack.c.bf16 %v2150_v36, %v2149_v24  ;;  %s2253_s0 = sshll.u32 %s2877_s5, 4  ;;  %s2254_s0 = int_to_ptr.vmem [resolvable:$true] %s2253_s0 }
0x1174   :  { %s2839_s26 = scalar_lea.vmem %s2254_s0, 256  ;;  %p2844_p1 = scmp.lt.s32.totalorder %s2254_s0, %s2254_s0 }
0x1175   :  { %2750 = vmatprep.subr.msk.bf16.mxu0 %vm2926_vm1, %v2748_v37  ;;  %p2840_p0 = scmp.ne.s32.totalorder %s2254_s0, %s2839_s26  ;;  %p2845_p2 = scmp.lt.s32.totalorder %s2839_s26, %s2839_s26 }
0x1176   :  { %2753 = vmatpush3.bf16.xpose.msk.msra.mxu0 %vm2926_vm1, %v2748_v37 }
0x1177   :  { %2756 = vmatprep.subr.msk.bf16.mxu0 %vm2926_vm1, %v2754_v41  ;;  %p2846_p3 = por %p2845_p2, %p2844_p1 }
0x1179   :  { %p2847_p4 = pnand %p2846_p3, %p2840_p0 }
0x117e   :  { %2759 = vmatpush3.bf16.xpose.msk.msra.mxu0 %vm2926_vm1, %v2754_v41 }
0x11e9   :  { %v1985_v26 = vpop.xlane.xlu0 %1984 }
0x11ea   :  { %v1986_v27 = vsub.f32 %v1979_v9, %v1985_v26 }
0x11ec   :  { %v1987_v57 = vmul.f32 1.442695, %v1986_v27 }
0x11ed   :  { %v1995_v28 = vpop.permute.xlu0 %1994 }
0x11ee   :  { %2835 = vpow2.f32 %v1987_v57  ;;  %2622 = vmatpush3.msra.mxu1 %v1995_v28 }
0x11ef   :  { %2740 = vmatprep.subr.bf16.mxu1 %v2871_v58 }
0x11f8   :  { %v2836_v29 = vpop.eup %2835 }
0x11f9   :  { %v1989_v30 = vsel %vm171_vm3, %v2836_v29, 0.0 }
0x11fa   :  { %1990 = vadd.xlane.f32.xlu1 %v1989_v30 }
0x122a   :  { %v1900_v21 = vpop.f32.mrb[14].mxu0 }
0x122b   :  { %v1904_v31 = vadd.f32 %v1900_v21, %v1663_v63  ;;  %v2615_v32 = vpop.f32.mrb[15].mxu0 }
0x1287   :  { %v1991_v33 = vpop.xlane.xlu1 %1990 }
0x1288   :  { %2837 = vrcp.f32 %v1991_v33 }
0x1292   :  { %v2838_v34 = vpop.eup %2837 }
0x1293   :  { %v1993_v35 = vmul.f32 %v2838_v34, %v2836_v29 }
0x1295   :  { %2624 = vmatmul.mubr.msk.f32.vlgmr.msra.gmra.mrb[30].mxu1 %vm171_vm3, %v1993_v35 }
0x1296   :  { %2743 = vmatpush3.bf16.xpose.msk.msra.mxu1 %vm3066_vm4, %v3197_v42 }
0x1297   :  { %2744 = vmatprep.subr.bf16.mxu1 %v2871_v58 }
0x129e   :  { %2747 = vmatpush3.bf16.xpose.msk.msra.mxu1 %vm3066_vm4, %v3203_v54 }
0x1368   :  { %v2066_v58 = vpop.f32.mrb[30].mxu1 }
0x1369   :  { %v2625_v38 = vpop.f32.mrb[31].mxu1  ;;  %2635 = vmatmul.mubr.msk.f32.vlgmr.msra.gmra.mrb[32].mxu1 %vm171_vm3, %v2066_v58 }
0x143c   :  { %v2139_v42 = vpop.f32.mrb[32].mxu1 }
0x143d   :  { %v2143_v43 = vadd.f32 %v2139_v42, %v1904_v31  ;;  %v2636_v44 = vpop.f32.mrb[33].mxu1 }
0x143f   :  { %v2144_v46 = vadd.f32 %v3230_v50, %v2143_v43 }
0x1441   :  { %v2145_v54 = vadd.f32 %v2144_v46, %v2991_v20 }
0x1443   :  { %2146 = vst.msk [vmem:[#allocation2 + $0x8] sm:$0xff] %vm45_vm0, %v2145_v54 }
0x144a   :  { %v2148_v47 = vld [vmem:[#allocation2 + $0x8] sm:$0xff] }
0x144b   :  { %2646 = vmatmul.mubr.msk.f32.vlgmr.msra.gmra.mrb[16].mxu0 %vm45_vm0, %v2148_v47 }
0x144c   :  { %2645 = vmatprep.mubr.msk.f32.mxu0 %vm45_vm0, %v2147_v48 }
0x151e   :  { %v2647_v49 = vpop.f32.mrb[16].mxu0 }
0x151f   :  { %v2243_v4 = vadd.f32 %v2647_v49, %v2148_v47  ;;  %v2237_v51 = vpop.f32.mrb[17].mxu0 }
0x1520   :  { %v2238_v10 = vadd.f32 %v2237_v51, %v2147_v48 }
0x1521   :  { %2247 = vst.msk [vmem:[#allocation3 + $0x8] sm:$0xff] %vm45_vm0, %v2243_v4 }
0x1522   :  { %2246 = vst.msk [vmem:[#allocation3] sm:$0xff] %vm45_vm0, %v2238_v10 }
0x1523   :  { %2850 = shalt.err (!%p2847_p4)
}
0x1524   :  { %s2851_s28 = scalar_lea.hbm %s3330_s6, 256 }
0x1525   :  { %p2852_p5 = scmp.ne.s32.totalorder %s3330_s6, %s2851_s28  ;;  %p2855_p6 = scmp.lt.u32.totalorder %s2851_s28, %s3330_s6 }
0x1527   :  { %p2857_p7 = pnand %p2855_p6, %p2852_p5 }
0x1529   :  { %2860 = shalt.err (!%p2857_p7)
}
0x152a   :  { %s2878_s9 = smov 128   ;;  %s2879_s10 = smov 8  }
0x152b   :  { %2259 = dma.vmem_to_hbm [thread:$0]  %s2254_s0, 256, %s3330_s6, [#allocation4], %s2878_s9, %s2878_s9, %s2879_s10  }
0x152c   :  { %2861 = dma.done.wait [#allocation4], 256  }
0x152d   :  { %2862 = vsyncadd [#allocation4], 4294967040 }
0x152e   :  { %2263 = vsyncpa [#allocation4], 1 }

</bundles_post_ra>
